<compile_context>
chip_gen: v7x
topology: tpu7x:2x2x1
jax: 0.10.0
libtpu: 0.0.40
codegen_flags: <defaults>
</compile_context>

<pallas_src>
import functools

import jax
import jax.numpy as jnp
from jax.experimental import pallas as pl
from jax.experimental.pallas import tpu as pltpu


def _round_up(x, m):
    return -(-x // m) * m


@functools.lru_cache(maxsize=None)
def _tpu_config():
    """(tc_max, vmem_limit_bytes, row_tile_block_budget_bytes) for the local chip."""
    kind = ""
    try:
        kind = jax.devices()[0].device_kind.lower()
    except Exception:
        pass
    cap = None
    get_info = getattr(pltpu, "get_tpu_info", None)
    if get_info is not None:
        try:
            cap = int(get_info().vmem_capacity_bytes)
        except Exception:
            cap = None
    if cap is None:
        cap = (64 << 20) if ("v7" in kind or "7x" in kind) else (128 << 20)
    vmem_limit = int(min(cap * 3 // 4, 100 << 20))       # 48 MiB on v7x, 96 MiB on v5e/v6e
    budget = vmem_limit * 3 // 5                          # per-step block budget (w/ slack)
    small_mxu = ("v5 lite" in kind) or ("v5e" in kind) or ("v5litepod" in kind) or ("v4" in kind)
    tc_max = 128 if small_mxu else 256
    return tc_max, vmem_limit, budget


def _pick_row_tile(H, W2, Cin, TC, budget):
    """Largest multiple-of-8 row tile whose working set fits the per-step budget.

    Per flattened-row element: input bf16 (double buffered) + output bf16 (db) +
    f32 accumulator + bf16 im2col staging + slack for matmul temporaries.
    Fixed: double-buffered weights + 8-row halo blocks.
    """
    per_row = W2 * (10 * Cin + 16 * TC)
    fixed = 36 * Cin * TC + 32 * W2 * Cin
    th = (budget - fixed) // max(per_row, 1)
    th = max(8, min(int(th), _round_up(H, 8)))
    return (th // 8) * 8


# --------------------------------------------------------------------------
# Pallas kernels
# --------------------------------------------------------------------------

def _conv3x3_relu_kernel(body_ref, halo_ref, w_ref, b_ref, o_ref, xk_ref, acc_ref,
                         *, W2: int, fold_dx: bool):
    """Fused 3x3 conv (stride 1, pad 1) + bias + ReLU on one (row-tile, cout-tile) block.

    body_ref: (TH*W2, Cin)      bf16  flattened zero-padded image rows of this tile
    halo_ref: (8*W2, Cin)       bf16  the 8 rows following the body (bottom halo)
    w_ref:    (3, 3*Cin, TC) or (9, Cin, TC)   bf16
    b_ref:    (1, TC)           f32
    o_ref:    (TH*W2, TC)       bf16  (2 junk columns per row, sliced away in glue)
    xk_ref:   staging scratch   bf16  (width-im2col or plain flat copy)
    acc_ref:  (TH*W2, TC)       f32
    """
    L = o_ref.shape[0]                 # TH*W2 flattened output rows
    B = body_ref.shape[0]              # == L
    LK = xk_ref.shape[0]               # L + 2*W2 + 8
    Cin = body_ref.shape[1]
    f32 = jnp.float32

    if fold_dx:
        # Stage width-only im2col: XK[i, dx*Cin:(dx+1)*Cin] = x_flat[i + dx].
        # The 3 dx taps fold into the contraction dim -> K = 3*Cin, 3 dots instead of 9.
        for dx in range(3):
            nb = B - dx
            lo, hi = dx * Cin, (dx + 1) * Cin            # lane-aligned (Cin % 128 == 0)
            xk_ref[0:nb, lo:hi] = body_ref[dx:B, :]
            xk_ref[nb:LK, lo:hi] = halo_ref[0:LK - nb, :]

        def d(dy):
            return jnp.dot(xk_ref[dy * W2:dy * W2 + L, :], w_ref[dy],
                           preferred_element_type=f32)
    else:
        # Cin not lane-aligned (Cin=64): stage a plain contiguous flat copy (stitches
        # body+halo) and group the 3 dx dots per dy into one expression so Mosaic can
        # accumulate MXU pops in vregs before touching the accumulator.
        xk_ref[0:B, :] = body_ref[...]
        xk_ref[B:LK, :] = halo_ref[0:LK - B, :]

        def d(dy):
            r = None
            for dx in range(3):
                off = dy * W2 + dx
                t = jnp.dot(xk_ref[off:off + L, :], w_ref[3 * dy + dx],
                            preferred_element_type=f32)
                r = t if r is None else r + t
            return r

    acc_ref[...] = d(0)
    acc_ref[...] += d(1)
    o_ref[...] = jnp.maximum(acc_ref[...] + d(2) + b_ref[...], 0.0).astype(o_ref.dtype)


def _matmul_bias_relu_kernel(x_ref, w_ref, b_ref, o_ref):
    """Plain (rows, K) x (K, Cout) matmul + bias + ReLU (im2col path for conv1_1)."""
    o_ref[...] = jnp.maximum(
        jnp.dot(x_ref[...], w_ref[...], preferred_element_type=jnp.float32)
        + b_ref[...], 0.0).astype(o_ref.dtype)


def _maxpool2x2_kernel(x_ref, o_ref):
    """2x2 / stride-2 max pool on lane/sublane-dense blocks.

    x_ref: (TP, 2, Wo, 2*C)   (row pairs; W pairs folded into the lane dim)
    o_ref: (TP, Wo, C)
    """
    C = o_ref.shape[-1]
    x = x_ref[...]
    r = jnp.maximum(x[:, 0], x[:, 1])                    # row-pair max  -> (TP, Wo, 2C)
    o_ref[...] = jnp.maximum(r[:, :, :C], r[:, :, C:])   # col-pair max  -> (TP, Wo, C)


# --------------------------------------------------------------------------
# Wrappers (glue: padding / layout / pallas_call)
# --------------------------------------------------------------------------

def conv3x3_relu(x_nhwc, w_hwio, b, *, row_tile=None):
    """x: (N,H,W,Cin); w: (3,3,Cin,Cout); b: (Cout,) -> (N,H,W,Cout) bf16."""
    N, H, W, Cin = x_nhwc.shape
    Cout = w_hwio.shape[-1]
    W2 = W + 2
    tc_max, vmem_limit, budget = _tpu_config()
    TC = min(Cout, tc_max)
    fold_dx = (Cin % 128 == 0)

    if row_tile is not None:
        TH = max(8, (min(int(row_tile), _round_up(H, 8)) // 8) * 8)
    else:
        TH = _pick_row_tile(H, W2, Cin, TC, budget)
        if N * (-(-H // TH)) * (Cout // TC) == 1 and H > 8:
            # Guarantee >=2 grid steps so a 2-TensorCore part (v7x) shards the row axis.
            TH = min(TH, _round_up(-(-H // 2), 8))
    R = -(-H // TH)
    Hp = TH * R
    L = TH * W2
    LK = L + 2 * W2 + 8
    THB = TH // 8

    # Zero padding: 1 top / (Hp-H)+8 bottom / 1 left / 1 right -> every tap window is a
    # contiguous slice of the row-flattened image (8 bottom rows also feed the halo).
    xp = jnp.pad(x_nhwc.astype(jnp.bfloat16),
                 ((0, 0), (1, Hp + 8 - 1 - H), (1, 1), (0, 0)))      # (N, Hp+8, W2, Cin)
    xflat = xp.reshape(N, (Hp + 8) * W2, Cin)                        # free reshape, no copy

    if fold_dx:
        wk = w_hwio.reshape(3, 3 * Cin, Cout).astype(jnp.bfloat16)
        w_spec = pl.BlockSpec((3, 3 * Cin, TC), lambda n, j, r: (0, 0, j))
        xk_shape = pltpu.VMEM((LK, 3 * Cin), jnp.bfloat16)
    else:
        wk = w_hwio.reshape(9, Cin, Cout).astype(jnp.bfloat16)
        w_spec = pl.BlockSpec((9, Cin, TC), lambda n, j, r: (0, 0, j))
        xk_shape = pltpu.VMEM((LK, Cin), jnp.bfloat16)
    b2 = b.reshape(1, Cout).astype(jnp.float32)

    out = pl.pallas_call(
        functools.partial(_conv3x3_relu_kernel, W2=W2, fold_dx=fold_dx),
        out_shape=jax.ShapeDtypeStruct((N, Hp * W2, Cout), jnp.bfloat16),
        # Row tiles innermost: the weight block index only changes with j, so Pallas
        # keeps it resident instead of re-fetching ~2.3 MiB of weights every step.
        grid=(N, Cout // TC, R),
        in_specs=[
            pl.BlockSpec((None, L, Cin), lambda n, j, r: (n, r, 0)),           # body rows
            pl.BlockSpec((None, 8 * W2, Cin),
                         lambda n, j, r: (n, (r + 1) * THB, 0)),               # 8-row halo
            w_spec,
            pl.BlockSpec((1, TC), lambda n, j, r: (0, j)),
        ],
        out_specs=pl.BlockSpec((None, L, TC), lambda n, j, r: (n, r, j)),
        scratch_shapes=[xk_shape, pltpu.VMEM((L, TC), jnp.float32)],
        compiler_params=pltpu.CompilerParams(
            dimension_semantics=("parallel", "parallel", "parallel"),
            vmem_limit_bytes=vmem_limit,
        ),
    )(xflat, xflat, wk, b2)

    return out.reshape(N, Hp, W2, Cout)[:, :H, :W, :]


def conv3x3_relu_im2col(x_nhwc, w_hwio, b):
    """First conv (tiny Cin): fold the 9 taps into the contraction dim (K = 9*Cin)."""
    N, H, W, Cin = x_nhwc.shape
    Cout = w_hwio.shape[-1]
    K = 9 * Cin
    _, vmem_limit, _ = _tpu_config()
    xp = jnp.pad(x_nhwc.astype(jnp.bfloat16), ((0, 0), (1, 1), (1, 1), (0, 0)))
    patches = jnp.concatenate(
        [xp[:, dy:dy + H, dx:dx + W, :] for dy in range(3) for dx in range(3)],
        axis=-1).reshape(N, H * W, K)

    L = H * W
    TR = L if L <= 4096 else 4096
    Lp = -(-L // TR) * TR
    if Lp != L:
        patches = jnp.pad(patches, ((0, 0), (0, Lp - L), (0, 0)))
    R = Lp // TR

    w2 = w_hwio.reshape(K, Cout).astype(jnp.bfloat16)
    b2 = b.reshape(1, Cout).astype(jnp.float32)

    out = pl.pallas_call(
        _matmul_bias_relu_kernel,
        out_shape=jax.ShapeDtypeStruct((N, Lp, Cout), jnp.bfloat16),
        grid=(N, R),
        in_specs=[
            pl.BlockSpec((None, TR, K), lambda n, r: (n, r, 0)),
            pl.BlockSpec((K, Cout), lambda n, r: (0, 0)),
            pl.BlockSpec((1, Cout), lambda n, r: (0, 0)),
        ],
        out_specs=pl.BlockSpec((None, TR, Cout), lambda n, r: (n, r, 0)),
        compiler_params=pltpu.CompilerParams(
            dimension_semantics=("parallel", "parallel"),
            vmem_limit_bytes=vmem_limit,
        ),
    )(patches, w2, b2)
    return out[:, :L, :].reshape(N, H, W, Cout)


def maxpool2x2_ceil(x_nhwc):
    """MaxPool2d(kernel=2, stride=2, ceil_mode=True) on NHWC."""
    N, H, W, C = x_nhwc.shape
    Ho, Wo = -(-H // 2), -(-W // 2)
    He, We = 2 * Ho, 2 * Wo
    xp = jnp.pad(x_nhwc, ((0, 0), (0, He - H), (0, We - W), (0, 0)),
                 constant_values=-jnp.inf)        # -inf padding == ceil_mode semantics
    xr = xp.reshape(N, Ho, 2, Wo, 2 * C)          # contiguous reshape (free)
    TP = next(t for t in (8, 4, 2, 1) if Ho % t == 0)

    out = pl.pallas_call(
        _maxpool2x2_kernel,
        out_shape=jax.ShapeDtypeStruct((N, Ho, Wo, C), x_nhwc.dtype),
        grid=(N, Ho // TP),
        in_specs=[pl.BlockSpec((None, TP, 2, Wo, 2 * C),
                               lambda n, h: (n, h, 0, 0, 0))],
        out_specs=pl.BlockSpec((None, TP, Wo, C), lambda n, h: (n, h, 0, 0)),
        compiler_params=pltpu.CompilerParams(
            dimension_semantics=("parallel", "parallel")),
    )(xr)
    return out


# --------------------------------------------------------------------------
# VGG19 (features[0:30]) parameters + forward
# --------------------------------------------------------------------------

# conv layers at torchvision feature indices 0,2,5,7,10,12,14,16,19,21,23,25,28
_VGG19_CONV_CFG = [
    (3, 64), (64, 64),
    (64, 128), (128, 128),
    (128, 256), (256, 256), (256, 256), (256, 256),
    (256, 512), (512, 512), (512, 512), (512, 512),
    (512, 512),
]


def init_vgg19_params(key):
    params = []
    for cin, cout in _VGG19_CONV_CFG:
        key, kw, kb = jax.random.split(key, 3)
        std = (2.0 / (9.0 * cin)) ** 0.5
        w = jax.random.normal(kw, (3, 3, cin, cout), jnp.float32) * std
        b = jax.random.normal(kb, (cout,), jnp.float32) * 0.01
        params.append((w, b))
    return params


def vgg19_slices(x_nchw, params):
    """Returns [h_relu1..h_relu5] as NCHW float32 arrays, matching the PyTorch module."""
    x = jnp.transpose(x_nchw, (0, 2, 3, 1)).astype(jnp.float32)   # NCHW -> NHWC
    it = iter(params)

    def conv(h):
        w, bb = next(it)
        if w.shape[2] <= 8:                       # Cin=3 first layer -> im2col path
            return conv3x3_relu_im2col(h, w, bb)
        return conv3x3_relu(h, w, bb)

    # slice1: conv1_1 + relu
    h1 = conv(x)
    # slice2: conv1_2 + relu, pool, conv2_1 + relu
    h = conv(h1); h = maxpool2x2_ceil(h); h2 = conv(h)
    # slice3: conv2_2 + relu, pool, conv3_1 + relu
    h = conv(h2); h = maxpool2x2_ceil(h); h3 = conv(h)
    # slice4: conv3_2..3_4 + relu, pool, conv4_1 + relu
    h = conv(h3); h = conv(h); h = conv(h); h = maxpool2x2_ceil(h); h4 = conv(h)
    # slice5: conv4_2..4_4 + relu, pool, conv5_1 + relu
    h = conv(h4); h = conv(h); h = conv(h); h = maxpool2x2_ceil(h); h5 = conv(h)

    to_nchw = lambda a: jnp.transpose(a, (0, 3, 1, 2)).astype(jnp.float32)
    return [to_nchw(v) for v in (h1, h2, h3, h4, h5)]


# --------------------------------------------------------------------------

if __name__ == "__main__":
    key = jax.random.PRNGKey(0)
    kx, kp, k1, k2, k3, k4 = jax.random.split(key, 6)

    # --- unit check 1: tiled conv (forces >1 row tile and Cout tiling) vs lax.conv ---
    xc = jax.random.normal(k1, (1, 20, 16, 64), jnp.float32)
    wc = jax.random.normal(k2, (3, 3, 64, 512), jnp.float32) * (2.0 / (9 * 64)) ** 0.5
    bc = jax.random.normal(k3, (512,), jnp.float32) * 0.01
    got = jax.jit(lambda a, w, b: conv3x3_relu(a, w, b, row_tile=8))(xc, wc, bc)
    ref = jax.lax.conv_general_dilated(
        xc.astype(jnp.bfloat16), wc.astype(jnp.bfloat16), (1, 1), "SAME",
        dimension_numbers=("NHWC", "HWIO", "NHWC"),
        preferred_element_type=jnp.float32)
    ref = jnp.maximum(ref + bc[None, None, None, :], 0.0).astype(jnp.bfloat16)
    assert bool(jnp.allclose(got.astype(jnp.float32), ref.astype(jnp.float32),
                             rtol=3e-2, atol=3e-2)), "tiled conv mismatch"

    # --- unit check 1b: Cin=128 layer exercises the K-folded (staged im2col) path ---
    xc2 = jax.random.normal(k1, (1, 12, 16, 128), jnp.float32)
    wc2 = jax.random.normal(k2, (3, 3, 128, 256), jnp.float32) * (2.0 / (9 * 128)) ** 0.5
    bc2 = jax.random.normal(k3, (256,), jnp.float32) * 0.01
    got2 = jax.jit(lambda a, w, b: conv3x3_relu(a, w, b, row_tile=8))(xc2, wc2, bc2)
    ref2 = jax.lax.conv_general_dilated(
        xc2.astype(jnp.bfloat16), wc2.astype(jnp.bfloat16), (1, 1), "SAME",
        dimension_numbers=("NHWC", "HWIO", "NHWC"),
        preferred_element_type=jnp.float32)
    ref2 = jnp.maximum(ref2 + bc2[None, None, None, :], 0.0).astype(jnp.bfloat16)
    assert bool(jnp.allclose(got2.astype(jnp.float32), ref2.astype(jnp.float32),
                             rtol=3e-2, atol=3e-2)), "K-folded conv mismatch"

    # --- unit check 2: ceil-mode maxpool on odd spatial dims vs jnp reference ---
    xm = jax.random.normal(k4, (1, 5, 7, 64), jnp.float32).astype(jnp.bfloat16)
    pool_got = jax.jit(maxpool2x2_ceil)(xm)
    xm_pad = jnp.pad(xm, ((0, 0), (0, 1), (0, 1), (0, 0)), constant_values=-jnp.inf)
    pool_ref = jnp.max(xm_pad.reshape(1, 3, 2, 4, 2, 64), axis=(2, 4))
    assert bool(jnp.array_equal(pool_got, pool_ref)), "maxpool mismatch"

    # --- end-to-end VGG19 feature slices on a small PyTorch-style NCHW input ---
    x = jax.random.normal(kx, (2, 3, 16, 16), jnp.float32)
    params = init_vgg19_params(kp)

    fwd = jax.jit(lambda inp: vgg19_slices(inp, params))
    feats = fwd(x)
    feats = jax.block_until_ready(feats)

    expected = [(2, 64, 16, 16), (2, 128, 8, 8), (2, 256, 4, 4),
                (2, 512, 2, 2), (2, 512, 1, 1)]
    got_shapes = [tuple(f.shape) for f in feats]
    assert got_shapes == expected, f"shape mismatch: {got_shapes} vs {expected}"
    assert all(bool(jnp.isfinite(f).all()) for f in feats)

    print("KERNEL_OK")
</pallas_src>

<mosaic_0001>
module attributes {stable_mosaic.version = 11 : i64} {
  func.func @_conv3x3_relu_kernel(%arg0: i32, %arg1: i32, %arg2: i32, %arg3: memref<1x144x64xbf16, #tpu.memory_space<vmem>>, %arg4: memref<1x144x64xbf16, #tpu.memory_space<vmem>>, %arg5: memref<9x64x256xbf16, #tpu.memory_space<vmem>>, %arg6: memref<1x256xf32, #tpu.memory_space<vmem>>, %arg7: memref<1x144x256xbf16, #tpu.memory_space<vmem>>, %arg8: memref<188x64xbf16, #tpu.memory_space<vmem>>, %arg9: memref<144x256xf32, #tpu.memory_space<vmem>>) attributes {dimension_semantics = [#tpu.dimension_semantics<parallel>, #tpu.dimension_semantics<parallel>, #tpu.dimension_semantics<parallel>], iteration_bounds = array<i64: 1, 2, 3>, scalar_prefetch = 0 : i64, scratch_operands = 2 : i64, tpu.core_type = #tpu.core_type<tc>, window_params = [{transform_indices = @transform_0, window_bounds = array<i64: 1, 144, 64>}, {transform_indices = @transform_1, window_bounds = array<i64: 1, 144, 64>}, {transform_indices = @transform_2, window_bounds = array<i64: 9, 64, 256>}, {transform_indices = @transform_3, window_bounds = array<i64: 1, 256>}, {transform_indices = @transform_4, window_bounds = array<i64: 1, 144, 256>}]} {
    %c0 = arith.constant 0 : index
    %c0_0 = arith.constant 0 : index
    %c0_1 = arith.constant 0 : index
    %0 = vector.load %arg3[%c0, %c0_0, %c0_1] : memref<1x144x64xbf16, #tpu.memory_space<vmem>>, vector<1x144x64xbf16>
    %1 = vector.shape_cast %0 : vector<1x144x64xbf16> to vector<144x64xbf16>
    %c0_2 = arith.constant 0 : index
    %c0_3 = arith.constant 0 : index
    %2 = vector.load %arg8[%c0_2, %c0_3] : memref<188x64xbf16, #tpu.memory_space<vmem>>, vector<144x64xbf16>
    tpu.vector_store %arg8[%c0_2, %c0_3], %1 {strides = array<i32>} : memref<188x64xbf16, #tpu.memory_space<vmem>>, vector<144x64xbf16>,
    %c0_4 = arith.constant 0 : index
    %c0_5 = arith.constant 0 : index
    %c0_6 = arith.constant 0 : index
    %3 = vector.load %arg4[%c0_4, %c0_5, %c0_6] : memref<1x144x64xbf16, #tpu.memory_space<vmem>>, vector<1x44x64xbf16>
    %4 = vector.shape_cast %3 : vector<1x44x64xbf16> to vector<44x64xbf16>
    %c144 = arith.constant 144 : index
    %c0_7 = arith.constant 0 : index
    %5 = vector.load %arg8[%c144, %c0_7] : memref<188x64xbf16, #tpu.memory_space<vmem>>, vector<44x64xbf16>
    tpu.vector_store %arg8[%c144, %c0_7], %4 {strides = array<i32>} : memref<188x64xbf16, #tpu.memory_space<vmem>>, vector<44x64xbf16>,
    %c0_8 = arith.constant 0 : index
    %c0_9 = arith.constant 0 : index
    %6 = vector.load %arg8[%c0_8, %c0_9] : memref<188x64xbf16, #tpu.memory_space<vmem>>, vector<144x64xbf16>
    %c0_10 = arith.constant 0 : index
    %c0_11 = arith.constant 0 : index
    %c0_12 = arith.constant 0 : index
    %7 = vector.load %arg5[%c0_10, %c0_11, %c0_12] : memref<9x64x256xbf16, #tpu.memory_space<vmem>>, vector<1x64x256xbf16>
    %8 = vector.shape_cast %7 : vector<1x64x256xbf16> to vector<64x256xbf16>
    %cst = arith.constant dense<0.000000e+00> : vector<144x256xf32>
    %9 = tpu.matmul %6, %8, %cst {dimension_numbers = #tpu.dot_dimension_numbers<[1], [0], [0], [1], [0, 0, 1, 1], [], []>} : vector<144x64xbf16>, vector<64x256xbf16>, vector<144x256xf32> -> vector<144x256xf32>
    %c1 = arith.constant 1 : index
    %c0_13 = arith.constant 0 : index
    %10 = vector.load %arg8[%c1, %c0_13] : memref<188x64xbf16, #tpu.memory_space<vmem>>, vector<144x64xbf16>
    %c1_14 = arith.constant 1 : index
    %c0_15 = arith.constant 0 : index
    %c0_16 = arith.constant 0 : index
    %11 = vector.load %arg5[%c1_14, %c0_15, %c0_16] : memref<9x64x256xbf16, #tpu.memory_space<vmem>>, vector<1x64x256xbf16>
    %12 = vector.shape_cast %11 : vector<1x64x256xbf16> to vector<64x256xbf16>
    %cst_17 = arith.constant dense<0.000000e+00> : vector<144x256xf32>
    %13 = tpu.matmul %10, %12, %cst_17 {dimension_numbers = #tpu.dot_dimension_numbers<[1], [0], [0], [1], [0, 0, 1, 1], [], []>} : vector<144x64xbf16>, vector<64x256xbf16>, vector<144x256xf32> -> vector<144x256xf32>
    %14 = arith.addf %9, %13 : vector<144x256xf32>
    %c2 = arith.constant 2 : index
    %c0_18 = arith.constant 0 : index
    %15 = vector.load %arg8[%c2, %c0_18] : memref<188x64xbf16, #tpu.memory_space<vmem>>, vector<144x64xbf16>
    %c2_19 = arith.constant 2 : index
    %c0_20 = arith.constant 0 : index
    %c0_21 = arith.constant 0 : index
    %16 = vector.load %arg5[%c2_19, %c0_20, %c0_21] : memref<9x64x256xbf16, #tpu.memory_space<vmem>>, vector<1x64x256xbf16>
    %17 = vector.shape_cast %16 : vector<1x64x256xbf16> to vector<64x256xbf16>
    %cst_22 = arith.constant dense<0.000000e+00> : vector<144x256xf32>
    %18 = tpu.matmul %15, %17, %cst_22 {dimension_numbers = #tpu.dot_dimension_numbers<[1], [0], [0], [1], [0, 0, 1, 1], [], []>} : vector<144x64xbf16>, vector<64x256xbf16>, vector<144x256xf32> -> vector<144x256xf32>
    %19 = arith.addf %14, %18 : vector<144x256xf32>
    %c0_23 = arith.constant 0 : index
    %c0_24 = arith.constant 0 : index
    %20 = vector.load %arg9[%c0_23, %c0_24] : memref<144x256xf32, #tpu.memory_space<vmem>>, vector<144x256xf32>
    tpu.vector_store %arg9[%c0_23, %c0_24], %19 {strides = array<i32>} : memref<144x256xf32, #tpu.memory_space<vmem>>, vector<144x256xf32>,
    %c0_25 = arith.constant 0 : index
    %c0_26 = arith.constant 0 : index
    %21 = vector.load %arg9[%c0_25, %c0_26] : memref<144x256xf32, #tpu.memory_space<vmem>>, vector<144x256xf32>
    %c18 = arith.constant 18 : index
    %c0_27 = arith.constant 0 : index
    %22 = vector.load %arg8[%c18, %c0_27] : memref<188x64xbf16, #tpu.memory_space<vmem>>, vector<144x64xbf16>
    %c3 = arith.constant 3 : index
    %c0_28 = arith.constant 0 : index
    %c0_29 = arith.constant 0 : index
    %23 = vector.load %arg5[%c3, %c0_28, %c0_29] : memref<9x64x256xbf16, #tpu.memory_space<vmem>>, vector<1x64x256xbf16>
    %24 = vector.shape_cast %23 : vector<1x64x256xbf16> to vector<64x256xbf16>
    %cst_30 = arith.constant dense<0.000000e+00> : vector<144x256xf32>
    %25 = tpu.matmul %22, %24, %cst_30 {dimension_numbers = #tpu.dot_dimension_numbers<[1], [0], [0], [1], [0, 0, 1, 1], [], []>} : vector<144x64xbf16>, vector<64x256xbf16>, vector<144x256xf32> -> vector<144x256xf32>
    %c19 = arith.constant 19 : index
    %c0_31 = arith.constant 0 : index
    %26 = vector.load %arg8[%c19, %c0_31] : memref<188x64xbf16, #tpu.memory_space<vmem>>, vector<144x64xbf16>
    %c4 = arith.constant 4 : index
    %c0_32 = arith.constant 0 : index
    %c0_33 = arith.constant 0 : index
    %27 = vector.load %arg5[%c4, %c0_32, %c0_33] : memref<9x64x256xbf16, #tpu.memory_space<vmem>>, vector<1x64x256xbf16>
    %28 = vector.shape_cast %27 : vector<1x64x256xbf16> to vector<64x256xbf16>
    %cst_34 = arith.constant dense<0.000000e+00> : vector<144x256xf32>
    %29 = tpu.matmul %26, %28, %cst_34 {dimension_numbers = #tpu.dot_dimension_numbers<[1], [0], [0], [1], [0, 0, 1, 1], [], []>} : vector<144x64xbf16>, vector<64x256xbf16>, vector<144x256xf32> -> vector<144x256xf32>
    %30 = arith.addf %25, %29 : vector<144x256xf32>
    %c20 = arith.constant 20 : index
    %c0_35 = arith.constant 0 : index
    %31 = vector.load %arg8[%c20, %c0_35] : memref<188x64xbf16, #tpu.memory_space<vmem>>, vector<144x64xbf16>
    %c5 = arith.constant 5 : index
    %c0_36 = arith.constant 0 : index
    %c0_37 = arith.constant 0 : index
    %32 = vector.load %arg5[%c5, %c0_36, %c0_37] : memref<9x64x256xbf16, #tpu.memory_space<vmem>>, vector<1x64x256xbf16>
    %33 = vector.shape_cast %32 : vector<1x64x256xbf16> to vector<64x256xbf16>
    %cst_38 = arith.constant dense<0.000000e+00> : vector<144x256xf32>
    %34 = tpu.matmul %31, %33, %cst_38 {dimension_numbers = #tpu.dot_dimension_numbers<[1], [0], [0], [1], [0, 0, 1, 1], [], []>} : vector<144x64xbf16>, vector<64x256xbf16>, vector<144x256xf32> -> vector<144x256xf32>
    %35 = arith.addf %30, %34 : vector<144x256xf32>
    %36 = arith.addf %21, %35 : vector<144x256xf32>
    %c0_39 = arith.constant 0 : index
    %c0_40 = arith.constant 0 : index
    %37 = vector.load %arg9[%c0_39, %c0_40] : memref<144x256xf32, #tpu.memory_space<vmem>>, vector<144x256xf32>
    tpu.vector_store %arg9[%c0_39, %c0_40], %36 {strides = array<i32>} : memref<144x256xf32, #tpu.memory_space<vmem>>, vector<144x256xf32>,
    %c0_41 = arith.constant 0 : index
    %c0_42 = arith.constant 0 : index
    %38 = vector.load %arg9[%c0_41, %c0_42] : memref<144x256xf32, #tpu.memory_space<vmem>>, vector<144x256xf32>
    %c36 = arith.constant 36 : index
    %c0_43 = arith.constant 0 : index
    %39 = vector.load %arg8[%c36, %c0_43] : memref<188x64xbf16, #tpu.memory_space<vmem>>, vector<144x64xbf16>
    %c6 = arith.constant 6 : index
    %c0_44 = arith.constant 0 : index
    %c0_45 = arith.constant 0 : index
    %40 = vector.load %arg5[%c6, %c0_44, %c0_45] : memref<9x64x256xbf16, #tpu.memory_space<vmem>>, vector<1x64x256xbf16>
    %41 = vector.shape_cast %40 : vector<1x64x256xbf16> to vector<64x256xbf16>
    %cst_46 = arith.constant dense<0.000000e+00> : vector<144x256xf32>
    %42 = tpu.matmul %39, %41, %cst_46 {dimension_numbers = #tpu.dot_dimension_numbers<[1], [0], [0], [1], [0, 0, 1, 1], [], []>} : vector<144x64xbf16>, vector<64x256xbf16>, vector<144x256xf32> -> vector<144x256xf32>
    %c37 = arith.constant 37 : index
    %c0_47 = arith.constant 0 : index
    %43 = vector.load %arg8[%c37, %c0_47] : memref<188x64xbf16, #tpu.memory_space<vmem>>, vector<144x64xbf16>
    %c7 = arith.constant 7 : index
    %c0_48 = arith.constant 0 : index
    %c0_49 = arith.constant 0 : index
    %44 = vector.load %arg5[%c7, %c0_48, %c0_49] : memref<9x64x256xbf16, #tpu.memory_space<vmem>>, vector<1x64x256xbf16>
    %45 = vector.shape_cast %44 : vector<1x64x256xbf16> to vector<64x256xbf16>
    %cst_50 = arith.constant dense<0.000000e+00> : vector<144x256xf32>
    %46 = tpu.matmul %43, %45, %cst_50 {dimension_numbers = #tpu.dot_dimension_numbers<[1], [0], [0], [1], [0, 0, 1, 1], [], []>} : vector<144x64xbf16>, vector<64x256xbf16>, vector<144x256xf32> -> vector<144x256xf32>
    %47 = arith.addf %42, %46 : vector<144x256xf32>
    %c38 = arith.constant 38 : index
    %c0_51 = arith.constant 0 : index
    %48 = vector.load %arg8[%c38, %c0_51] : memref<188x64xbf16, #tpu.memory_space<vmem>>, vector<144x64xbf16>
    %c8 = arith.constant 8 : index
    %c0_52 = arith.constant 0 : index
    %c0_53 = arith.constant 0 : index
    %49 = vector.load %arg5[%c8, %c0_52, %c0_53] : memref<9x64x256xbf16, #tpu.memory_space<vmem>>, vector<1x64x256xbf16>
    %50 = vector.shape_cast %49 : vector<1x64x256xbf16> to vector<64x256xbf16>
    %cst_54 = arith.constant dense<0.000000e+00> : vector<144x256xf32>
    %51 = tpu.matmul %48, %50, %cst_54 {dimension_numbers = #tpu.dot_dimension_numbers<[1], [0], [0], [1], [0, 0, 1, 1], [], []>} : vector<144x64xbf16>, vector<64x256xbf16>, vector<144x256xf32> -> vector<144x256xf32>
    %52 = arith.addf %47, %51 : vector<144x256xf32>
    %53 = arith.addf %38, %52 : vector<144x256xf32>
    %c0_55 = arith.constant 0 : index
    %c0_56 = arith.constant 0 : index
    %54 = vector.load %arg6[%c0_55, %c0_56] : memref<1x256xf32, #tpu.memory_space<vmem>>, vector<1x256xf32>
    %55 = vector.broadcast %54 : vector<1x256xf32> to vector<144x256xf32>
    %56 = arith.addf %53, %55 : vector<144x256xf32>
    %cst_57 = arith.constant 0.000000e+00 : f32
    %57 = vector.broadcast %cst_57 : f32 to vector<144x256xf32>
    %58 = arith.maximumf %56, %57 : vector<144x256xf32>
    %59 = arith.truncf %58 : vector<144x256xf32> to vector<144x256xbf16>
    %c0_58 = arith.constant 0 : index
    %c0_59 = arith.constant 0 : index
    %c0_60 = arith.constant 0 : index
    %60 = vector.load %arg7[%c0_58, %c0_59, %c0_60] : memref<1x144x256xbf16, #tpu.memory_space<vmem>>, vector<1x144x256xbf16>
    %61 = vector.shape_cast %60 : vector<1x144x256xbf16> to vector<144x256xbf16>
    %62 = vector.shape_cast %59 : vector<144x256xbf16> to vector<1x144x256xbf16>
    tpu.vector_store %arg7[%c0_58, %c0_59, %c0_60], %62 {strides = array<i32>} : memref<1x144x256xbf16, #tpu.memory_space<vmem>>, vector<1x144x256xbf16>,
    return
  }
  func.func @transform_0(%arg0: i32, %arg1: i32, %arg2: i32) -> (i32, i32, i32) {
    %c0_i32 = arith.constant 0 : i32
    %c0_i32_0 = arith.constant 0 : i32
    return %arg0, %arg2, %c0_i32 : i32, i32, i32
  }
  func.func @transform_1(%arg0: i32, %arg1: i32, %arg2: i32) -> (i32, i32, i32) {
    %c1_i32 = arith.constant 1 : i32
    %0 = arith.addi %arg2, %c1_i32 : i32
    %c1_i32_0 = arith.constant 1 : i32
    %1 = arith.muli %0, %c1_i32_0 : i32
    %c0_i32 = arith.constant 0 : i32
    %c0_i32_1 = arith.constant 0 : i32
    return %arg0, %1, %c0_i32 : i32, i32, i32
  }
  func.func @transform_2(%arg0: i32, %arg1: i32, %arg2: i32) -> (i32, i32, i32) {
    %c0_i32 = arith.constant 0 : i32
    %c0_i32_0 = arith.constant 0 : i32
    %c0_i32_1 = arith.constant 0 : i32
    return %c0_i32, %c0_i32_0, %arg1 : i32, i32, i32
  }
  func.func @transform_3(%arg0: i32, %arg1: i32, %arg2: i32) -> (i32, i32) {
    %c0_i32 = arith.constant 0 : i32
    %c0_i32_0 = arith.constant 0 : i32
    return %c0_i32, %arg1 : i32, i32
  }
  func.func @transform_4(%arg0: i32, %arg1: i32, %arg2: i32) -> (i32, i32, i32) {
    %c0_i32 = arith.constant 0 : i32
    return %arg0, %arg2, %arg1 : i32, i32, i32
  }
}

</mosaic_0001>

<bundles_post_ra>
// kernel: _lambda_.1
= control target key start
LH: loop header
LB: loop body
LE: loop exit
PB: predicated region body
PF: predicated region fallthrough
CT: control target
= control target key end

     0   :  { %s5912_s0 = inlined_call_operand.hbm [shape: bf16[1,576,64], index: 0, kind: input, shape index: {}, may-alias: {0,1}]   ;;  %s5913_s1 = inlined_call_operand.hbm [shape: bf16[1,576,64], index: 1, kind: input, shape index: {}, may-alias: {0,1}]   ;;  %s5914_s2 = inlined_call_operand.hbm [shape: bf16[9,64,512], index: 2, kind: input, shape index: {}]   ;;  %s5915_s3 = inlined_call_operand.hbm [shape: f32[1,512], index: 3, kind: input, shape index: {}]   ;;  %s5916_s4 = inlined_call_operand.hbm [shape: bf16[1,432,512], index: 4, kind: output, shape index: {}]  }
   0x1   :  { %5940 = sst [smem:[#allocation33_spill]] %s5912_s0 }
   0x2   :  { %5941 = sst [smem:[#allocation34_spill]] %s5913_s1 }
   0x3   :  { %5942 = sst [smem:[#allocation35_spill]] %s5916_s4 }
   0x4   :  { %9 = vsyncpa [#allocation5], 0 }
   0x5   :  { %11 = vsyncpa [#allocation5 + $0x1], 0 }
   0x6   :  { %12 = vsyncpa [#allocation8], 0 }
   0x7   :  { %14 = vsyncpa [#allocation8 + $0x1], 0 }
   0x8   :  { %15 = vsyncpa [#allocation11], 0 }
   0x9   :  { %17 = vsyncpa [#allocation11 + $0x1], 0 }
   0xa   :  { %18 = vsyncpa [#allocation6], 0 }
   0xb   :  { %20 = vsyncpa [#allocation6 + $0x1], 0  ;;  %s4781_s15 = smov 0   ;;  %s4783_s16 = smov 0  }
   0xc   :  { %s4785_s17 = smov 0   ;;  %s4787_s18 = smov 0  }
   0xd   :  { %s4789_s19 = smov 0   ;;  %s4791_s20 = smov 0  }
   0xe   :  { %s4793_s21 = smov 0   ;;  %s4795_s22 = smov 0  }
   0xf   :  { %s4797_s23 = smov 0   ;;  %s4799_s24 = smov 0  }
  0x10   :  { %s4801_s25 = smov 0   ;;  %s4803_s26 = smov 0  }
  0x11   :  { %s4805_s27 = smov 0   ;;  %s4807_s28 = smov 0  }
  0x12   :  { %s4809_s29 = smov 0   ;;  %s4811_s30 = smov 0  }
  0x13   :  { %s4813_s5 = smov 0  }
  0x14 LB: > { %5943 = sst [smem:[#allocation18_spill]] %s4676_s15  ;;  %s4867_s6 = sadd.s32 4294967295, %s4740_s5   ;;  %s4740_s5 = sphi %s4813_s5, %s26_s5   ;;  %s4736_s30 = sphi %s4811_s30, %s6019_s30   ;;  %s4732_s29 = sphi %s4809_s29, %s6018_s29   ;;  %s4728_s28 = sphi %s4807_s28, %s6017_s28   ;;  %s4724_s27 = sphi %s4805_s27, %s6016_s27   ;;  %s4720_s26 = sphi %s4803_s26, %s6015_s26   ;;  %s4716_s25 = sphi %s4801_s25, %s6014_s25   ;;  %s4712_s24 = sphi %s4799_s24, %s6013_s24   ;;  %s4708_s23 = sphi %s4797_s23, %s6000_s23   ;;  %s4704_s22 = sphi %s4795_s22, %s6012_s22   ;;  %s4700_s21 = sphi %s4793_s21, %s6011_s21   ;;  %s4696_s20 = sphi %s4791_s20, %s6010_s20   ;;  %s4692_s19 = sphi %s4789_s19, %s6009_s19   ;;  %s4688_s18 = sphi %s4787_s18, %s5997_s18   ;;  %s4684_s17 = sphi %s4785_s17, %s6008_s17   ;;  %s4680_s16 = sphi %s4783_s16, %s6006_s16   ;;  %s4676_s15 = sphi %s4781_s15, %s6005_s15  }
  0x15   : > { %5944 = sst [smem:[#allocation19_spill]] %s4684_s17  ;;  %s38_s8 = sadd.s32 1, %s4732_s29 }
  0x16   : > { %5945 = sst [smem:[#allocation20_spill]] %s4692_s19  ;;  %s41_s9 = sadd.s32 1, %s4736_s30 }
  0x17   : > { %5946 = sst [smem:[#allocation21_spill]] %s4708_s23  ;;  %p39_p0 = scmp.ge.s32.totalorder %s38_s8, 3 }
  0x18   : > { %5947 = sst [smem:[#allocation22_spill]] %s4724_s27  ;;  %p5932_p1 = scmp.eq.s32.totalorder %s4740_s5, 0 }
  0x19   : > { %5948 = sst [smem:[#allocation23_spill]] %s4728_s28  ;;  %p5920_p2 = scmp.eq.s32.totalorder %s4867_s6, 0 }
  0x1a   : > { %5949 = sst [smem:[#allocation24_spill]] %s4732_s29  ;;  %s84_s10 = sadd.s32 1, %s4708_s23 }
  0x1b   : > { %s4875_s11 = scalar_select %p39_p0, 0, %s38_s8  }
  0x1c   : > { %s6021_s9 = smov (!%p39_p0, %s41_s9), %s4736_s30  ;;  %p91_p5 = scmp.ne.s32.totalorder %s4708_s23, %s4704_s22 }
  0x1d   : > { %5950 = sst [smem:[#allocation25_spill]] %s4875_s11  ;;  %s4880_s12 = ssub.s32 %s4732_s29, %s4875_s11 }
  0x1e   : > { %s78_s13 = sadd.s32 1, %s4875_s11  ;;  %p43_p3 = scmp.ge.s32.totalorder %s6021_s9, 2 }
  0x1f   : > { %s80_s14 = ssub.s32 %s38_s8, %s78_s13  ;;  %p4890_p7 = por %p91_p5, %p5932_p1 }
  0x20   : > { %s6023_s9 = smov (%p43_p3, %s6021_s9), 0  ;;  %p82_p6 = scmp.eq.s32.totalorder %s80_s14, 0 }
  0x21   : > { %5951 = sst [smem:[#allocation26_spill]] %s6023_s9  ;;  %p97_p8 = scmp.ne.s32.totalorder %s4704_s22, %s4700_s21 }
  0x22   : > { %s107_s11 = ssub.s32 %s4736_s30, %s6023_s9  ;;  %s110_s13 = sadd.s32 1, %s4696_s20 }
  0x23   : > { %s4899_s4 = scalar_select %p82_p6, %s4708_s23, %s84_s10  }
  0x24   : > { %p4903_p9 = por %p97_p8, %p5920_p2  ;;  %p108_p10 = scmp.eq.s32.totalorder %s107_s11, 0 }
  0x25   : > { %5953 = sst [smem:[#allocation27_spill]] %s4899_s4  ;;  %p117_p11 = scmp.ne.s32.totalorder %s4696_s20, %s4692_s19 }
  0x26   : > { %s5954_s8 = scalar_select %p4903_p9, 1, 0 }
  0x27   : > { %s4911_s14 = scalar_select %p108_p10, %s4696_s20, %s110_s13  }
  0x28   : > { %p4915_p12 = por %p117_p11, %p5932_p1  ;;  %p123_p13 = scmp.ne.s32.totalorder %s4692_s19, %s4688_s18 }
  0x29   : > { %5955 = sst [smem:[#allocation28_spill]] %s4911_s14  ;;  %s163_s10 = sor.u32 %s107_s11, %s4880_s12 }
  0x2a   : > { %s166_s9 = sadd.s32 1, %s4684_s17  ;;  %p4925_p0 = por %p123_p13, %p5920_p2 }
  0x2b   : > { %p164_p3 = scmp.eq.s32.totalorder %s163_s10, 0  ;;  %p176_p5 = scmp.ne.s32.totalorder %s4684_s17, %s4680_s16 }
  0x2c   : > { %s5957_s4 = scalar_select %p4925_p0, 1, 0 }
  0x2d   : > { %p177_p6 = scmp.eq.s32.totalorder %s4867_s6, 5  ;;  %p182_p10 = scmp.ne.s32.totalorder %s4680_s16, %s4676_s15 }
  0x2e   : > { %5958 = sst [smem:[#allocation29_spill]] %s5957_s4  ;;  %s5962_s18 = sadd.s32 4294967294, %s4740_s5  }
  0x2f   : > { %s4933_s13 = scalar_select %p164_p3, %s4684_s17, %s166_s9  }
  0x30   : > { %p4935_p8 = por %p177_p6, %p176_p5  ;;  %p183_p11 = scmp.eq.s32.totalorder %s5962_s18, 5 }
  0x31   : > { %5959 = sst [smem:[#allocation30_spill]] %s4933_s13  ;;  %p5931_p13 = scmp.lt.s32.totalorder %s4740_s5, 6 }
  0x32   : > { %s5960_s14 = scalar_select %p4935_p8, 1, 0 }
  0x33   : > { %s5925_s11 = smul.u32 1152, %s4732_s29  ;;  %p4945_p2 = por %p183_p11, %p182_p10 }
  0x34   : > { %5961 = sst [smem:[#allocation31_spill]] %s5960_s14  ;;  %s226_s10 = sand.u32 1, %s4740_s5  }
  0x35   : > { %s5963_s28 = scalar_select %p4945_p2, 1, 0 }
  0x36   : > { %s228_s27 = sand.u32 1, %s4708_s23   ;;  %s5965_s1 = sld [smem:[#allocation34_spill]] }
  0x37   : > { %5964 = sst [smem:[#allocation32_spill]] %s5963_s28  ;;  %s4106_s4 = smul.u32 72, %s228_s27 }
  0x38   : > { %p4962_p3 = pnand %p5931_p13, %p4890_p7  ;;  %p4970_p5 = pnand %p5931_p13, %p4915_p12 }
  0x39   : > { %s230_s19 = scalar_lea.vmem [#allocation7], %s4106_s4  ;;  %s4976_s7 = scalar_lea.sflag [#allocation8], %s226_s10 }
  0x3a   : > { %s240_s9 = sshll.u32 %s230_s19, 4  ;;  %p4439_p7 = pneg %p4962_p3  ;;  %s4974_s9 = int_to_ptr.vmem [resolvable:$true] %s240_s9 }
  0x3c   : > { %s3382_s13 = scalar_lea.hbm %s5965_s1, %s5925_s11  ;;  %s4442_s28 = scalar_lea.hbm %s5965_s1, 4608 }
  0x3d   : > { %s4956_s17 = scalar_lea.hbm %s3382_s13, 1152  ;;  %s4467_s11 = scalar_lea.hbm %s3382_s13, 2304 }
  0x3e   : > { %p4438_p6 = scmp.ne.s32.totalorder %s4956_s17, %s4467_s11  ;;  %p4443_p12 = scmp.lt.u32.totalorder %s4956_s17, %s5965_s1 }
  0x3f   : > { %p4444_p13 = scmp.lt.u32.totalorder %s4442_s28, %s4467_s11  ;;  %p4446_p4 = scmp.lt.u32.totalorder %s4467_s11, %s4956_s17 }
  0x40   : > { %p4440_p10 = pnand %p4439_p7, %p4438_p6 }
  0x41   : > { %p4445_p1 = por %p4444_p13, %p4443_p12 }
  0x42   : > { %p4441_p11 = pneg %p4440_p10 }
  0x43   : > { %p4447_p2 = por %p4446_p4, %p4445_p1 }
  0x45   : > { %p4448_p8 = pnand %p4447_p2, %p4441_p11 }
  0x47   : > { %4451 = shalt.err (!%p4448_p8)
}
  0x48   : > { %s4452_s4 = scalar_lea.vmem %s4974_s9, 1152  ;;  %s4742_s23 = smov [#allocation7]  }
  0x49   : > { %p4453_p6 = scmp.ne.s32.totalorder %s4974_s9, %s4452_s4  ;;  %s4457_s13 = sshll.u32 %s4742_s23, 4  ;;  %s4458_s13 = int_to_ptr.vmem [resolvable:$false] %s4457_s13 }
  0x4a   : > { %s4459_s15 = scalar_lea.vmem %s4458_s13, 2304  ;;  %p4460_p9 = scmp.lt.s32.totalorder %s4974_s9, %s4458_s13 }
  0x4b   : > { %p4455_p10 = pnand %p4453_p6, %p4439_p7  ;;  %p4461_p13 = scmp.lt.s32.totalorder %s4459_s15, %s4452_s4 }
  0x4d   : > { %p4456_p0 = pneg %p4455_p10  ;;  %p4462_p12 = por %p4461_p13, %p4460_p9 }
  0x4f   : > { %p4463_p1 = pnand %p4462_p12, %p4456_p0 }
  0x51   : > { %4466 = shalt.err (!%p4463_p1)
}
  0x52   : > { %s5936_s28 = smov 64   ;;  %s5937_s14 = smov 4  }
  0x53   : > { %4128 = dma.hbm_to_vmem [thread:$0]  (!%p4962_p3), %s4956_s17, 1152, %s4974_s9, %s4976_s7, %s5936_s28, %s5936_s28, %s5937_s14  }
  0x54   : > { %p3510_p2 = scmp.ge.s32.totalorder %s4740_s5, 1  ;;  %p288_p4 = scmp.lt.s32.totalorder %s4740_s5, 7 }
  0x55   : > { %s54_s10 = sadd.s32 1, %s4720_s26  ;;  %p5969_p0 = scmp.eq.s32.totalorder %s4880_s12, 0 }
  0x56   : > { %p5008_p9 = pnand %p3510_p2, %p288_p4  ;;  %p61_p8 = scmp.ne.s32.totalorder %s4720_s26, %s4716_s25 }
  0x57   : > { %s5016_s19 = scalar_select %p5969_p0, %s4720_s26, %s54_s10  }
  0x58   : > { %s5968_s11 = scalar_select %p5008_p9, 1, 0 }
  0x59   : > { %p67_p7 = scmp.ne.s32.totalorder %s4716_s25, %s4712_s24  ;;  %s203_s21 = sand.u32 1, %s4720_s26  }
  0x5a   : > { %s5970_s4 = smul.u32 1152, %s4732_s29  ;;  %s5971_s0 = sld [smem:[#allocation33_spill]] }
  0x5b   : > { %p5972_p3 = scmp.eq.s32.totalorder %s4740_s5, 0  ;;  %p5973_p6 = scmp.eq.s32.totalorder %s4867_s6, 0 }
  0x5c   : > { %s4105_s12 = smul.u32 72, %s203_s21  ;;  %p5975_p13 = scmp.lt.s32.totalorder %s4740_s5, 6 }
  0x5d   : > { %p63_p11 = por %p5972_p3, %p61_p8  ;;  %p5034_p10 = por %p5973_p6, %p67_p7 }
  0x5e   : > { %s5045_s9 = sand.u32 1, %s4696_s20   ;;  %s207_s10 = scalar_lea.vmem [#allocation4], %s4105_s12 }
  0x5f   : > { %s5974_s17 = scalar_select %p5034_p10, 1, 0 }
  0x60   : > { %s5028_s13 = scalar_lea.hbm %s5971_s0, %s5970_s4  ;;  %p5040_p12 = pnand %p5975_p13, %p63_p11 }
  0x61   : > { %s216_s4 = sshll.u32 %s207_s10, 4  ;;  %s5050_s23 = scalar_lea.sflag [#allocation5], %s203_s21  ;;  %s5048_s4 = int_to_ptr.vmem [resolvable:$true] %s216_s4 }
  0x62   : > { %s4468_s18 = scalar_lea.hbm %s5028_s13, 1152  ;;  %p4470_p2 = pneg %p5040_p12 }
  0x63   : > { %p4469_p1 = scmp.ne.s32.totalorder %s5028_s13, %s4468_s18  ;;  %s4473_s1 = scalar_lea.hbm %s5971_s0, 4608 }
  0x64   : > { %p4474_p8 = scmp.lt.u32.totalorder %s5028_s13, %s5971_s0  ;;  %p4475_p7 = scmp.lt.u32.totalorder %s4473_s1, %s4468_s18 }
  0x65   : > { %p4471_p4 = pnand %p4470_p2, %p4469_p1  ;;  %p4477_p11 = scmp.lt.u32.totalorder %s4468_s18, %s5028_s13 }
  0x66   : > { %p4476_p3 = por %p4475_p7, %p4474_p8 }
  0x67   : > { %p4472_p0 = pneg %p4471_p4 }
  0x68   : > { %p4478_p6 = por %p4477_p11, %p4476_p3 }
  0x6a   : > { %p4479_p13 = pnand %p4478_p6, %p4472_p0 }
  0x6c   : > { %4482 = shalt.err (!%p4479_p13)
}
  0x6d   : > { %s4483_s21 = scalar_lea.vmem %s5048_s4, 1152  ;;  %s4745_s28 = smov [#allocation4]  }
  0x6e   : > { %p4484_p1 = scmp.ne.s32.totalorder %s5048_s4, %s4483_s21  ;;  %s4488_s14 = sshll.u32 %s4745_s28, 4  ;;  %s4489_s14 = int_to_ptr.vmem [resolvable:$false] %s4488_s14 }
  0x6f   : > { %s4490_s29 = scalar_lea.vmem %s4489_s14, 2304  ;;  %p4491_p9 = scmp.lt.s32.totalorder %s5048_s4, %s4489_s14 }
  0x70   : > { %p4486_p4 = pnand %p4484_p1, %p4470_p2  ;;  %p4492_p8 = scmp.lt.s32.totalorder %s4490_s29, %s4483_s21 }
  0x72   : > { %p4487_p10 = pneg %p4486_p4  ;;  %p4493_p7 = por %p4492_p8, %p4491_p9 }
  0x74   : > { %p4494_p3 = pnand %p4493_p7, %p4487_p10 }
  0x76   : > { %4497 = shalt.err (!%p4494_p3)
}
  0x77   : > { %s5977_s1 = smov 4   ;;  %s5978_s12 = smov 64  }
  0x78   : > { %4125 = dma.hbm_to_vmem [thread:$0]  (!%p5040_p12), %s5028_s13, 1152, %s5048_s4, %s5050_s23, %s5978_s12, %s5978_s12, %s5977_s1  }
  0x79   : > { %s3788_s15 = sshll.u32 %s4736_s30, 7  ;;  %s5979_s10 = smul.u32 576, %s5045_s9 }
  0x7a   : > { %s5087_s29 = scalar_lea.hbm %s5914_s2, %s3788_s15  ;;  %p4500_p10 = pneg %p4970_p5 }
  0x7b   : > { %s254_s18 = scalar_lea.vmem [#allocation9], %s5979_s10  ;;  %s4498_s24 = scalar_lea.hbm %s5087_s29, 9216 }
  0x7c   : > { %s261_s21 = sshll.u32 %s254_s18, 4  ;;  %p4499_p9 = scmp.ne.s32.totalorder %s5087_s29, %s4498_s24  ;;  %s5089_s21 = int_to_ptr.vmem [resolvable:$true] %s261_s21 }
  0x7d   : > { %s4503_s23 = scalar_lea.hbm %s5914_s2, 18432  ;;  %p4504_p0 = scmp.lt.u32.totalorder %s5087_s29, %s5914_s2 }
  0x7e   : > { %p4501_p12 = pnand %p4500_p10, %p4499_p9  ;;  %p4505_p11 = scmp.lt.u32.totalorder %s4503_s23, %s4498_s24 }
  0x7f   : > { %p4507_p13 = scmp.lt.u32.totalorder %s4498_s24, %s5087_s29 }
  0x80   : > { %p4502_p2 = pneg %p4501_p12  ;;  %p4506_p6 = por %p4505_p11, %p4504_p0 }
  0x82   : > { %p4508_p1 = por %p4507_p13, %p4506_p6 }
  0x84   : > { %p4509_p4 = pnand %p4508_p1, %p4502_p2 }
  0x86   : > { %4512 = shalt.err (!%p4509_p4)
}
  0x87   : > { %s4513_s15 = scalar_lea.vmem %s5089_s21, 9216  ;;  %s4746_s10 = smov [#allocation9]  }
  0x88   : > { %p4514_p8 = scmp.ne.s32.totalorder %s5089_s21, %s4513_s15  ;;  %s4518_s18 = sshll.u32 %s4746_s10, 4  ;;  %s4519_s18 = int_to_ptr.vmem [resolvable:$false] %s4518_s18 }
  0x89   : > { %s4520_s28 = scalar_lea.vmem %s4519_s18, 18432  ;;  %p4521_p9 = scmp.lt.s32.totalorder %s5089_s21, %s4519_s18 }
  0x8a   : > { %p4516_p7 = pnand %p4514_p8, %p4500_p10  ;;  %p4522_p12 = scmp.lt.s32.totalorder %s4520_s28, %s4513_s15 }
  0x8c   : > { %p4517_p3 = pneg %p4516_p7  ;;  %p4523_p0 = por %p4522_p12, %p4521_p9 }
  0x8e   : > { %p4524_p11 = pnand %p4523_p0, %p4517_p3 }
  0x90   : > { %4527 = shalt.err (!%p4524_p11)
}
  0x91   : > { %s4747_s14 = smov 256   ;;  %s4748_s24 = smov 128  }
  0x92   : > { %s4749_s13 = smov 8   ;;  %s3507_s4 = sshll.u32 %s5045_s9, 1 }
  0x93   : > { %4131 = dma.hbm_to_vmem [thread:$0]  (!%p4970_p5), %s5087_s29, 9216, %s5089_s21, %s4976_s7, %s4747_s14, %s4748_s24, %s4749_s13  }
  0x94   : > { %s3789_s23 = sshll.u32 %s4736_s30, 5  ;;  %s275_s10 = scalar_lea.vmem [#allocation10], %s3507_s4 }
  0x95   : > { %s5122_s15 = scalar_lea.hbm %s5915_s3, %s3789_s23  ;;  %s283_s18 = sshll.u32 %s275_s10, 4  ;;  %s284_s18 = int_to_ptr.vmem [resolvable:$true] %s283_s18 }
  0x96   : > { %s272_s28 = scalar_lea.sflag [#allocation11], %s5045_s9  ;;  %s4528_s0 = scalar_lea.hbm %s5122_s15, 32 }
  0x97   : > { %p4529_p2 = scmp.ne.s32.totalorder %s5122_s15, %s4528_s0  ;;  %s4533_s29 = scalar_lea.hbm %s5915_s3, 64 }
  0x98   : > { %p4534_p1 = scmp.lt.u32.totalorder %s5122_s15, %s5915_s3  ;;  %p4535_p4 = scmp.lt.u32.totalorder %s4533_s29, %s4528_s0 }
  0x99   : > { %p4531_p6 = pnand %p4529_p2, %p4500_p10  ;;  %p4537_p7 = scmp.lt.u32.totalorder %s4528_s0, %s5122_s15 }
  0x9a   : > { %p4536_p8 = por %p4535_p4, %p4534_p1 }
  0x9b   : > { %p4532_p13 = pneg %p4531_p6 }
  0x9c   : > { %p4538_p3 = por %p4537_p7, %p4536_p8 }
  0x9e   : > { %p4539_p9 = pnand %p4538_p3, %p4532_p13 }
  0xa0   : > { %4542 = shalt.err (!%p4539_p9)
}
  0xa1   : > { %s4543_s9 = scalar_lea.vmem %s284_s18, 32  ;;  %s4750_s13 = smov [#allocation10]  }
  0xa2   : > { %p4544_p12 = scmp.ne.s32.totalorder %s284_s18, %s4543_s9  ;;  %s4548_s4 = sshll.u32 %s4750_s13, 4  ;;  %s4549_s4 = int_to_ptr.vmem [resolvable:$false] %s4548_s4 }
  0xa3   : > { %s4550_s23 = scalar_lea.vmem %s4549_s4, 64  ;;  %p4551_p2 = scmp.lt.s32.totalorder %s284_s18, %s4549_s4 }
  0xa4   : > { %p4546_p0 = pnand %p4544_p12, %p4500_p10  ;;  %p4552_p6 = scmp.lt.s32.totalorder %s4550_s23, %s4543_s9 }
  0xa6   : > { %p4547_p11 = pneg %p4546_p0  ;;  %p4553_p1 = por %p4552_p6, %p4551_p2 }
  0xa8   : > { %p4554_p4 = pnand %p4553_p1, %p4547_p11 }
  0xaa   : > { %4557 = shalt.err (!%p4554_p4)
}
  0xab   : > { %4134 = dma.hbm_to_vmem [thread:$0]  (!%p4970_p5), %s5122_s15, 32, %s284_s18, %s272_s28  }
  0xac   : > { %p5980_p13 = scmp.ne.s32.totalorder %s5968_s11, 0 }
  0xad   : > { %s294_s0 = sand.u32 (!%p5980_p13), 1, %s4716_s25   ;;  %p5981_p10 = scmp.ne.s32.totalorder (!%p5980_p13), %s5974_s17, 0 }
  0xae   : > { %292 = sbr.rel (%p5980_p13) target bundleno = 783 (0x30f), region = 36  ;;  %s295_s12 = scalar_lea.sflag (!%p5980_p13), [#allocation5], %s294_s0 }
  0xaf   : > { %s4108_s1 = smul.u32 (!%p5980_p13), 72, %s294_s0 }
  0xb1   : > { %s5147_s10 = scalar_lea.vmem (!%p5980_p13), [#allocation4], %s4108_s1 }
  0xb5   : > { %4655 = dma.done.wait (%p5981_p10), %s295_s12, 1152  }
  0xb6   : > { %4657 = vsyncadd (%p5981_p10), %s295_s12, 4294966144  ;;  %s303_s27 = sand.u32 1, %s4867_s6   ;;  %s305_s15 = sand.u32 1, %s4704_s22  }
  0xb7   : > { %s4109_s18 = smul.u32 72, %s305_s15  ;;  %s304_s11 = scalar_lea.sflag [#allocation8], %s303_s27 }
  0xb8   : > { %p5982_p5 = scmp.ne.s32.totalorder %s5954_s8, 0 }
  0xb9   : > { %s5155_s28 = scalar_lea.vmem [#allocation7], %s4109_s18 }
  0xba   : > { %4659 = dma.done.wait (%p5982_p5), %s304_s11, 1152  }
  0xbb   : > { %4661 = vsyncadd (%p5982_p5), %s304_s11, 4294966144  ;;  %s5983_s7 = sld [smem:[#allocation20_spill]]  ;;  %s5984_s21 = sld [smem:[#allocation29_spill]] }
  0xc1   : > { %s314_s29 = sand.u32 1, %s5983_s7   ;;  %p5985_p8 = scmp.ne.s32.totalorder %s5984_s21, 0 }
  0xc2   : > { %s4110_s14 = smul.u32 576, %s314_s29 }
  0xc4   : > { %s5162_s17 = scalar_lea.vmem [#allocation9], %s4110_s14 }
  0xc5   : > { %4663 = dma.done.wait (%p5985_p8), %s304_s11, 9216  }
  0xc6   : > { %4665 = vsyncadd (%p5985_p8), %s304_s11, 4294958080  ;;  %s3511_s6 = sshll.u32 %s314_s29, 1  ;;  %s322_s24 = scalar_lea.sflag [#allocation11], %s314_s29 }
  0xc7   : > { %s5168_s9 = scalar_lea.vmem [#allocation10], %s3511_s6 }
  0xc8   : > { %4667 = dma.done.wait (%p5985_p8), %s322_s24, 32  }
  0xc9   : > { %4669 = vsyncadd (%p5985_p8), %s322_s24, 4294967264  ;;  %v4751_v0 = vmov 0   ;;  %v4286_v1 = vld [vmem:[%s5162_s17 + $0x44] ss:$8 sps:$4 sm:$0xff]   ;;  %v4290_v3 = vld [vmem:[%s5162_s17 + $0x40] ss:$8 sps:$4 sm:$0xff]  }
  0xca   : > { %684 = vmatprep.mubr.bf16.mxu1 %v4751_v0  ;;  %1774 = vmatprep.mubr.bf16.mxu0 %v4751_v0  ;;  %v4288_v2 = vld [vmem:[%s5162_s17 + $0xc4] ss:$8 sps:$4 sm:$0xff]   ;;  %v4291_v4 = vld [vmem:[%s5162_s17 + $0xc0] ss:$8 sps:$4 sm:$0xff]   ;;  %v4292_v5 = vld [vmem:[%s5162_s17 + $0x54] ss:$8 sps:$4 sm:$0xff]  }
  0xcb   : > { %652 = vmatprep.subr.bf16.mxu1 %v4286_v1  ;;  %1742 = vmatprep.subr.bf16.mxu0 %v4288_v2  ;;  %v4294_v6 = vld [vmem:[%s5162_s17 + $0xd4] ss:$8 sps:$4 sm:$0xff]   ;;  %v4296_v7 = vld [vmem:[%s5162_s17 + $0x50] ss:$8 sps:$4 sm:$0xff]   ;;  %v4298_v9 = vld [vmem:[%s5162_s17 + $0x64] ss:$8 sps:$4 sm:$0xff]  }
  0xcc   : > { %653 = vmatpush1.bf16.msra.mxu1 %v4290_v3  ;;  %1743 = vmatpush1.bf16.msra.mxu0 %v4291_v4  ;;  %v4297_v8 = vld [vmem:[%s5162_s17 + $0xd0] ss:$8 sps:$4 sm:$0xff]   ;;  %v4300_v10 = vld [vmem:[%s5162_s17 + $0xe4] ss:$8 sps:$4 sm:$0xff]   ;;  %v4302_v11 = vld [vmem:[%s5162_s17 + $0x60] ss:$8 sps:$4 sm:$0xff]  }
  0xcd   : > { %654 = vmatprep.subr.bf16.mxu1 %v4292_v5  ;;  %1744 = vmatprep.subr.bf16.mxu0 %v4294_v6  ;;  %v4303_v12 = vld [vmem:[%s5162_s17 + $0xe0] ss:$8 sps:$4 sm:$0xff]   ;;  %v4304_v13 = vld [vmem:[%s5162_s17 + $0x74] ss:$8 sps:$4 sm:$0xff]   ;;  %vm391_vm0 = vcmask 519168   ;;  %vm624_vm2 = vcmask 523264  }
  0xce   : > { %v4306_v14 = vld [vmem:[%s5162_s17 + $0xf4] ss:$8 sps:$4 sm:$0xff]   ;;  %v4308_v15 = vld [vmem:[%s5162_s17 + $0x70] ss:$8 sps:$4 sm:$0xff]   ;;  %v373_v16 = vld [vmem:[%s5147_s10] sm:$0xf] }
  0xcf   : > { %v374_v17 = vld [vmem:[%s5147_s10 + $0x4] sm:$0xf]  ;;  %v375_v18 = vld [vmem:[%s5147_s10 + $0x8] sm:$0xf]  ;;  %v376_v19 = vld [vmem:[%s5147_s10 + $0xc] sm:$0xf] }
  0xd0   : > { %655 = vmatpush1.bf16.msra.mxu1 %v4296_v7  ;;  %1745 = vmatpush1.bf16.msra.mxu0 %v4297_v8  ;;  %392 = vst.msk [vmem:[#allocation2] sm:$0xf] %vm391_vm0, %v373_v16  ;;  %393 = vst.msk [vmem:[#allocation2 + $0x4] sm:$0xf] %vm391_vm0, %v374_v17  ;;  %v377_v20 = vld [vmem:[%s5147_s10 + $0x10] sm:$0xf] }
  0xd1   : > { %656 = vmatprep.subr.bf16.mxu1 %v4298_v9  ;;  %1746 = vmatprep.subr.bf16.mxu0 %v4300_v10  ;;  %394 = vst.msk [vmem:[#allocation2 + $0x8] sm:$0xf] %vm391_vm0, %v375_v18  ;;  %v378_v21 = vld [vmem:[%s5147_s10 + $0x14] sm:$0xf]  ;;  %v4309_v22 = vld [vmem:[%s5162_s17 + $0xf0] ss:$8 sps:$4 sm:$0xff]  }
  0xd2   : > { %395 = vst.msk [vmem:[#allocation2 + $0xc] sm:$0xf] %vm391_vm0, %v376_v19  ;;  %396 = vst.msk [vmem:[#allocation2 + $0x10] sm:$0xf] %vm391_vm0, %v377_v20  ;;  %v4316_v23 = vld [vmem:[%s5162_s17 + $0x144] ss:$8 sps:$4 sm:$0xff]  }
  0xd3   : > { %397 = vst.msk [vmem:[#allocation2 + $0x14] sm:$0xf] %vm391_vm0, %v378_v21  ;;  %v4320_v24 = vld [vmem:[%s5162_s17 + $0x4] ss:$8 sps:$4 sm:$0xff]   ;;  %v379_v25 = vld [vmem:[%s5147_s10 + $0x18] sm:$0xf] }
  0xd4   : > { %657 = vmatpush1.bf16.msra.mxu1 %v4302_v11  ;;  %1747 = vmatpush1.bf16.msra.mxu0 %v4303_v12  ;;  %v380_v26 = vld [vmem:[%s5147_s10 + $0x1c] sm:$0xf]  ;;  %398 = vst.msk [vmem:[#allocation2 + $0x18] sm:$0xf] %vm391_vm0, %v379_v25  ;;  %v381_v27 = vld [vmem:[%s5147_s10 + $0x20] sm:$0xf] }
  0xd5   : > { %658 = vmatprep.subr.bf16.mxu1 %v4304_v13  ;;  %1748 = vmatprep.subr.bf16.mxu0 %v4306_v14  ;;  %399 = vst.msk [vmem:[#allocation2 + $0x1c] sm:$0xf] %vm391_vm0, %v380_v26  ;;  %vm507_vm1 = vsmask.f32 7424  ;;  %v382_v28 = vld [vmem:[%s5147_s10 + $0x24] sm:$0xf] }
  0xd6   : > { %400 = vst.msk [vmem:[#allocation2 + $0x20] sm:$0xf] %vm391_vm0, %v381_v27  ;;  %401 = vst.msk [vmem:[#allocation2 + $0x24] sm:$0xf] %vm391_vm0, %v382_v28  ;;  %v4314_v40 = vld [vmem:[%s5162_s17 + $0x140] ss:$8 sps:$4 sm:$0xff]  }
  0xd7   : > { %v423_v29 = vld [vmem:[#allocation2] sm:$0xf]  ;;  %v5213_v30 = vld [vmem:[#allocation2 + $0x4] sm:$0xf]  ;;  %vm969_vm3 = vcmask 1046528   ;;  %vm1878_vm4 = vcmask 1045504  }
  0xd8   : > { %659 = vmatpush1.bf16.msra.mxu1 %v4308_v15  ;;  %1749 = vmatpush1.bf16.msra.mxu0 %v4309_v22  ;;  %v5217_v31 = vcombine.low %v423_v29, %v5213_v30  ;;  %v1287_v33 = vld [vmem:[#allocation2 + $0x8] sm:$0xe]  ;;  %v4324_v42 = vld [vmem:[%s5162_s17 + $0x154] ss:$8 sps:$4 sm:$0xff]   ;;  %v4322_v53 = vld [vmem:[%s5162_s17 + $0x150] ss:$8 sps:$4 sm:$0xff]  }
  0xd9   : > { %833 = vmatprep.subr.bf16.mxu1 %v4320_v24  ;;  %1965 = vmatprep.subr.bf16.mxu0 %v4316_v23  ;;  %v5219_v32 = vld [vmem:[#allocation2 + $0x8] sm:$0xff]   ;;  %v4332_v62 = vld [vmem:[%s5162_s17 + $0x10] ss:$8 sps:$4 sm:$0xff]   ;;  %v4334_v63 = vld [vmem:[%s5162_s17 + $0x14] ss:$8 sps:$4 sm:$0xff]   ;;  %vm2823_vm7 = vcmask 1044480  }
  0xda   : > { %v5221_v34 = vld [vmem:[#allocation2 + $0xc] sm:$0xf]  ;;  %v509_v35 = vshrl.u32 %v5217_v31, 16  ;;  %v511_v36 = vshll.u32 %v5217_v31, 16  ;;  %v516_v37 = vshll.u32 %v5219_v32, 16  ;;  %v5229_v39 = vld [vmem:[#allocation2 + $0x10] sm:$0xff]  }
  0xdb   : > { %v5227_v38 = vcombine.low %v1287_v33, %v5221_v34  ;;  %v5232_v41 = vld [vmem:[#allocation2 + $0x10] sm:$0xff]   ;;  %v1657_v46 = vrot.slane %v5229_v39, 1  ;;  %v4318_v47 = vld [vmem:[%s5162_s17] ss:$8 sps:$4 sm:$0xff]   ;;  %v520_v51 = vshrl.u32 %v5219_v32, 16  ;;  %s362_s8 = sand.u32 1, %s4680_s16  }
  0xdc   : > { %v513_v43 = vrot.slane %v511_v36, 1  ;;  %v518_v44 = vrot.slane %v516_v37, 1  ;;  %v5238_v48 = vld [vmem:[#allocation2 + $0x18] sm:$0xff]   ;;  %v524_v52 = vshll.u32 %v5232_v41, 16  ;;  %v4329_v57 = vld [vmem:[%s5162_s17 + $0x164] ss:$8 sps:$4 sm:$0xff]  }
  0xdd   : > { %v1656_v45 = vrot.slane %v5227_v38, 1  ;;  %v1659_v55 = vrot.slane %v5238_v48, 1  ;;  %v5248_v56 = vld [vmem:[#allocation2 + $0x18] sm:$0xff]   ;;  %v383_v58 = vld [vmem:[%s5147_s10 + $0x28] sm:$0xf]  ;;  %v5260_v2 = vld [vmem:[#allocation2 + $0x20] sm:$0xff]  }
  0xde   : > { %v514_v49 = vor.u32 %v513_v43, %v509_v35  ;;  %v522_v59 = vor.u32 %v520_v51, %v518_v44  ;;  %v526_v60 = vrot.slane %v524_v52, 1  ;;  %v384_v61 = vld [vmem:[%s5147_s10 + $0x2c] sm:$0xf]  ;;  %402 = vst.msk [vmem:[#allocation2 + $0x28] sm:$0xf] %vm391_vm0, %v383_v58  ;;  %v528_v8 = vshrl.u32 %v5232_v41, 16 }
  0xdf   : > { %v1658_v50 = vsel %vm969_vm3, %v1656_v45, %v1657_v46  ;;  %403 = vst.msk [vmem:[#allocation2 + $0x2c] sm:$0xf] %vm391_vm0, %v384_v61  ;;  %v1660_v1 = vsel %vm969_vm3, %v1657_v46, %v1659_v55  ;;  %v4327_v3 = vld [vmem:[%s5162_s17 + $0x160] ss:$8 sps:$4 sm:$0xff]   ;;  %v4337_v4 = vld [vmem:[%s5162_s17 + $0x174] ss:$8 sps:$4 sm:$0xff]  }
  0xe0   : > { %3642 = vmatmul.mubr.msk.bf16.vlgmr.msra.gmra.mrb[0].mxu0 %vm624_vm2, %v1658_v50  ;;  %v519_v54 = vsel %vm507_vm1, %v514_v49, %v518_v44  ;;  %v385_v5 = vld [vmem:[%s5147_s10 + $0x30] sm:$0xf]  ;;  %v386_v6 = vld [vmem:[%s5147_s10 + $0x34] sm:$0xf]  ;;  %v527_v7 = vsel %vm507_vm1, %v522_v59, %v526_v60  ;;  %v532_v9 = vshll.u32 %v5248_v56, 16  ;;  %v1661_v12 = vrot.slane %v5260_v2, 1 }
  0xe1   : > { %1966 = vmatpush1.bf16.msra.mxu0 %v4314_v40  ;;  %1784 = vmatprep.mubr.bf16.mxu0 %v4751_v0  ;;  %v4335_v10 = vld [vmem:[%s5162_s17 + $0x170] ss:$8 sps:$4 sm:$0xff]   ;;  %404 = vst.msk [vmem:[#allocation2 + $0x30] sm:$0xf] %vm391_vm0, %v385_v5  ;;  %405 = vst.msk [vmem:[#allocation2 + $0x34] sm:$0xf] %vm391_vm0, %v386_v6  ;;  %v530_v16 = vor.u32 %v528_v8, %v526_v60 }
  0xe2   : > { %3538 = vmatmul.mubr.msk.bf16.vlgmr.msra.gmra.mrb[0].mxu1 %vm624_vm2, %v519_v54  ;;  %1967 = vmatprep.subr.bf16.mxu0 %v4324_v42  ;;  %v4343_v11 = vld [vmem:[%s5162_s17 + $0x1c4] ss:$8 sps:$4 sm:$0xff]   ;;  %v4344_v13 = vld [vmem:[%s5162_s17 + $0x20] ss:$8 sps:$4 sm:$0xff]   ;;  %v534_v17 = vrot.slane %v532_v9, 1  ;;  %v1662_v21 = vsel %vm969_vm3, %v1659_v55, %v1661_v12  ;;  %v536_v25 = vshrl.u32 %v5248_v56, 16 }
  0xe3   : > { %694 = vmatprep.mubr.bf16.mxu1 %v4751_v0  ;;  %834 = vmatpush1.bf16.msra.mxu1 %v4318_v47  ;;  %v4346_v14 = vld [vmem:[%s5162_s17 + $0x24] ss:$8 sps:$4 sm:$0xff]   ;;  %v387_v15 = vld [vmem:[%s5147_s10 + $0x38] sm:$0xf]  ;;  %v389_v20 = vld [vmem:[%s5147_s10 + $0x40] sm:$0xf] }
  0xe4   : > { %835 = vmatprep.subr.bf16.mxu1 %v4334_v63  ;;  %v5281_v18 = vld [vmem:[#allocation2 + $0x20] sm:$0xff]   ;;  %406 = vst.msk [vmem:[#allocation2 + $0x38] sm:$0xf] %vm391_vm0, %v387_v15  ;;  %408 = vst.msk [vmem:[#allocation2 + $0x40] sm:$0xf] %vm391_vm0, %v389_v20  ;;  %v535_v24 = vsel %vm507_vm1, %v530_v16, %v534_v17  ;;  %v538_v35 = vor.u32 %v536_v25, %v534_v17  ;;  %v1882_v8 = vrot.slane %v5238_v48, 2 }
  0xe5   : > { %1968 = vmatpush1.bf16.msra.mxu0 %v4322_v53  ;;  %v388_v19 = vld [vmem:[%s5147_s10 + $0x3c] sm:$0xf]  ;;  %v390_v23 = vld [vmem:[%s5147_s10 + $0x44] sm:$0xf]  ;;  %v540_v26 = vshll.u32 %v5281_v18, 16  ;;  %v544_v44 = vshrl.u32 %v5281_v18, 16 }
  0xe6   : > { %1969 = vmatprep.subr.bf16.mxu0 %v4329_v57  ;;  %v5287_v22 = vld [vmem:[#allocation2 + $0x28] sm:$0xff]   ;;  %407 = vst.msk [vmem:[#allocation2 + $0x3c] sm:$0xf] %vm391_vm0, %v388_v19  ;;  %409 = vst.msk [vmem:[#allocation2 + $0x44] sm:$0xf] %vm391_vm0, %v390_v23  ;;  %v1884_v20 = vrot.slane %v5260_v2, 2 }
  0xe7   : > { %836 = vmatpush1.bf16.msra.mxu1 %v4332_v62  ;;  %v1663_v27 = vrot.slane %v5287_v22, 1  ;;  %v4352_v28 = vld [vmem:[%s5162_s17 + $0x30] ss:$8 sps:$4 sm:$0xff]   ;;  %v4354_v29 = vld [vmem:[%s5162_s17 + $0x34] ss:$8 sps:$4 sm:$0xff]   ;;  %v542_v36 = vrot.slane %v540_v26, 1 }
  0xe8   : > { %3643 = vmatmul.mubr.msk.bf16.gmra.mrb[4].mxu0 %vm624_vm2, %v1660_v1  ;;  %837 = vmatprep.subr.bf16.mxu1 %v4346_v14  ;;  %v410_v33 = vld [vmem:[%s5155_s28] sm:$0xf]  ;;  %v5304_v37 = vld [vmem:[#allocation2 + $0x28] sm:$0xff]   ;;  %v411_v53 = vld [vmem:[%s5155_s28 + $0x4] sm:$0xf]  ;;  %s4111_s13 = smul.u32 144, %s362_s8 }
  0xe9   : > { %1794 = vmatprep.mubr.bf16.mxu0 %v4751_v0  ;;  %1970 = vmatpush1.bf16.msra.mxu0 %v4327_v3  ;;  %416 = vst.msk [vmem:[#allocation2 + $0x48] sm:$0xf] %vm391_vm0, %v410_v33  ;;  %v1664_v40 = vsel %vm969_vm3, %v1661_v12, %v1663_v27  ;;  %v5308_v42 = vld [vmem:[#allocation2 + $0x30] sm:$0xff]   ;;  %v543_v43 = vsel %vm507_vm1, %v538_v35, %v542_v36  ;;  %v548_v45 = vshll.u32 %v5304_v37, 16  ;;  %v4361_v46 = vld [vmem:[%s5162_s17 + $0x84] ss:$8 sps:$4 sm:$0xff]  }
  0xea   : > { %3539 = vmatmul.mubr.msk.bf16.gmra.mrb[4].mxu1 %vm624_vm2, %v527_v7  ;;  %1971 = vmatprep.subr.bf16.mxu0 %v4337_v4  ;;  %v1665_v47 = vrot.slane %v5308_v42, 1  ;;  %v1865_v49 = vld [vmem:[#allocation2 + $0x8] sm:$0xc]  ;;  %v546_v50 = vor.u32 %v544_v44, %v542_v36  ;;  %v5319_v52 = vld [vmem:[#allocation2 + $0x30] sm:$0xff]   ;;  %417 = vst.msk [vmem:[#allocation2 + $0x4c] sm:$0xf] %vm391_vm0, %v411_v53 }
  0xeb   : > { %704 = vmatprep.mubr.bf16.mxu1 %v4751_v0  ;;  %838 = vmatpush1.bf16.msra.mxu1 %v4344_v13  ;;  %v550_v51 = vrot.slane %v548_v45, 1  ;;  %v3659_v55 = vcombine.low %v1865_v49, %v5221_v34  ;;  %v412_v57 = vld [vmem:[%s5155_s28 + $0x8] sm:$0xf]  ;;  %v552_v58 = vshrl.u32 %v5304_v37, 16  ;;  %v556_v60 = vshll.u32 %v5319_v52, 16  ;;  %s5752_s4 = scalar_lea.vmem [#allocation12], %s4111_s13 }
  0xec   : > { %839 = vmatprep.subr.bf16.mxu1 %v4354_v29  ;;  %v1666_v54 = vsel %vm969_vm3, %v1663_v27, %v1665_v47  ;;  %418 = vst.msk [vmem:[#allocation2 + $0x50] sm:$0xf] %vm391_vm0, %v412_v57  ;;  %v1880_v34 = vrot.slane %v5229_v39, 2  ;;  %v4341_v4 = vld [vmem:[%s5162_s17 + $0x1c0] ss:$8 sps:$4 sm:$0xff]   ;;  %v560_v7 = vshrl.u32 %v5319_v52, 16 }
  0xed   : > { %1972 = vmatpush1.bf16.msra.mxu0 %v4335_v10  ;;  %v551_v59 = vsel %vm507_vm1, %v546_v50, %v550_v51  ;;  %v1879_v61 = vrot.slane %v3659_v55, 2  ;;  %v554_v62 = vor.u32 %v552_v58, %v550_v51  ;;  %v558_v63 = vrot.slane %v556_v60, 1  ;;  %v5337_v1 = vld [vmem:[#allocation2 + $0x38] sm:$0xff]   ;;  %v4358_v10 = vld [vmem:[%s5162_s17 + $0x1e4] ss:$8 sps:$4 sm:$0xff]   ;;  %s5986_s23 = sld [smem:[#allocation22_spill]] }
  0xee   : > { %2475 = vmatprep.subr.bf16.mxu0 %v4343_v11  ;;  %v4351_v5 = vld [vmem:[%s5162_s17 + $0x1d4] ss:$8 sps:$4 sm:$0xff]   ;;  %v564_v39 = vshll.u32 %v5337_v1, 16  ;;  %v4349_v9 = vld [vmem:[%s5162_s17 + $0x1d0] ss:$8 sps:$4 sm:$0xff]   ;;  %v5352_v13 = vld [vmem:[#allocation2 + $0x40] sm:$0xff]   ;;  %v1883_v14 = vsel %vm1878_vm4, %v1880_v34, %v1882_v8 }
  0xef   : > { %840 = vmatpush1.bf16.msra.mxu1 %v4352_v28  ;;  %v1881_v3 = vsel %vm1878_vm4, %v1879_v61, %v1880_v34  ;;  %v559_v6 = vsel %vm507_vm1, %v554_v62, %v558_v63  ;;  %v562_v11 = vor.u32 %v560_v7, %v558_v63  ;;  %v4356_v15 = vld [vmem:[%s5162_s17 + $0x1e0] ss:$8 sps:$4 sm:$0xff]   ;;  %v4366_v16 = vld [vmem:[%s5162_s17 + $0x1f4] ss:$8 sps:$4 sm:$0xff]   ;;  %v568_v17 = vshrl.u32 %v5337_v1, 16  ;;  %s5987_s0 = sld [smem:[#allocation23_spill]] }
  0xf0   : > { %3644 = vmatmul.mubr.msk.bf16.gmra.mrb[8].mxu0 %vm624_vm2, %v1662_v21  ;;  %1056 = vmatprep.subr.bf16.mxu1 %v4361_v46  ;;  %v566_v12 = vrot.slane %v564_v39, 1  ;;  %v572_v19 = vshll.u32 %v5352_v13, 16  ;;  %v4364_v21 = vld [vmem:[%s5162_s17 + $0x1f0] ss:$8 sps:$4 sm:$0xff]   ;;  %v4376_v23 = vld [vmem:[%s5162_s17 + $0x184] ss:$8 sps:$4 sm:$0xff]   ;;  %v1885_v28 = vsel %vm1878_vm4, %v1882_v8, %v1884_v20 }
  0xf1   : > { %1804 = vmatprep.mubr.bf16.mxu0 %v4751_v0  ;;  %v5367_v26 = vld [vmem:[#allocation2 + $0x48] ss:$0 sps:$4 sm:$0x11]   ;;  %v413_v27 = vld [vmem:[%s5155_s28 + $0xc] sm:$0xf]  ;;  %v576_v35 = vshrl.u32 %v5352_v13, 16 }
  0xf2   : > { %3540 = vmatmul.mubr.msk.bf16.gmra.mrb[8].mxu1 %vm624_vm2, %v535_v24  ;;  %v567_v48 = vsel %vm507_vm1, %v562_v11, %v566_v12  ;;  %v570_v24 = vor.u32 %v568_v17, %v566_v12  ;;  %v574_v25 = vrot.slane %v572_v19, 1  ;;  %419 = vst.msk [vmem:[#allocation2 + $0x54] sm:$0xf] %vm391_vm0, %v413_v27  ;;  %v414_v29 = vld [vmem:[%s5155_s28 + $0x10] sm:$0xf]  ;;  %v580_v36 = vshll.u32 %v5367_v26, 16 }
  0xf3   : > { %714 = vmatprep.mubr.bf16.mxu1 %v4751_v0  ;;  %420 = vst.msk [vmem:[#allocation2 + $0x58] sm:$0xf] %vm391_vm0, %v414_v29  ;;  %v1888_v49 = vrot.slane %v5308_v42, 2  ;;  %v5390_v51 = vld [vmem:[#allocation2 + $0x38] sm:$0xff]   ;;  %v4359_v53 = vld [vmem:[%s5162_s17 + $0x80] ss:$8 sps:$4 sm:$0xff]  }
  0xf4   : > { %v575_v33 = vsel %vm507_vm1, %v570_v24, %v574_v25  ;;  %v582_v44 = vrot.slane %v580_v36, 1  ;;  %v1890_v55 = vrot.slane %v5390_v51, 2  ;;  %v4368_v57 = vld [vmem:[%s5162_s17 + $0x90] ss:$8 sps:$4 sm:$0xff]   ;;  %v4379_v58 = vld [vmem:[%s5162_s17 + $0xa4] ss:$8 sps:$4 sm:$0xff]  }
  0xf5   : > { %v5403_v60 = vld [vmem:[#allocation2 + $0x40] sm:$0xff]   ;;  %v4387_v34 = vld [vmem:[%s5162_s17 + $0xb4] ss:$8 sps:$4 sm:$0xff]   ;;  %v4385_v62 = vld [vmem:[%s5162_s17 + $0xb0] ss:$8 sps:$4 sm:$0xff]   ;;  %s3808_s1 = smul.u32 72, %s5986_s23 }
  0xf6   : > { %v4377_v61 = vld [vmem:[%s5162_s17 + $0xa0] ss:$8 sps:$4 sm:$0xff]   ;;  %v4395_v63 = vld [vmem:[%s5162_s17 + $0x104] ss:$8 sps:$4 sm:$0xff]   ;;  %v5423_v7 = vld [vmem:[#allocation2 + $0x14] sm:$0xf] }
  0xf7   : > { %v5426_v39 = vld [vmem:[#allocation2 + $0x18] sm:$0xff]   ;;  %vm2318_vm5 = vsmask.f32 5376  ;;  %vm1373_vm6 = vsmask.f32 6400  ;;  %s3782_s12 = sshll.u32 %s5987_s0, 1 }
  0xf8   : > { %3645 = vmatmul.mubr.msk.bf16.gmra.mrb[12].mxu0 %vm624_vm2, %v1664_v40  ;;  %v1886_v40 = vrot.slane %v5287_v22, 2  ;;  %v2328_v11 = vshrl.u32 %v5426_v39, 16  ;;  %s3329_s10 = sadd.s32 %s3808_s1, %s3782_s12  ;;  %s5988_s27 = sld [smem:[#allocation31_spill]] }
  0xf9   : > { %1814 = vmatprep.mubr.bf16.mxu0 %v4751_v0  ;;  %s3334_s15 = sshll.u32 %s5752_s4, 4  ;;  %s3784_s18 = sshll.u32 %s3329_s10, 6  ;;  %s5816_s15 = int_to_ptr.vmem [resolvable:$true] %s3334_s15 }
  0xfa   : > { %3541 = vmatmul.mubr.msk.bf16.gmra.mrb[12].mxu1 %vm624_vm2, %v543_v43  ;;  %v578_v43 = vor.u32 %v576_v35, %v574_v25  ;;  %v1887_v45 = vsel %vm1878_vm4, %v1884_v20, %v1886_v40  ;;  %v1889_v50 = vsel %vm1878_vm4, %v1886_v40, %v1888_v49  ;;  %v5456_v40 = vld [vmem:[#allocation2 + $0x28] sm:$0xff]   ;;  %s5989_s7 = sld [smem:[#allocation35_spill]]  ;;  %s5827_s29 = scalar_lea.sflag [#allocation6], %s362_s8 }
  0xfb   : > { %724 = vmatprep.mubr.bf16.mxu1 %v4751_v0  ;;  %s4558_s14 = scalar_lea.vmem %s5816_s15, 2304 }
  0xfc   : > { %v583_v46 = vsel %vm507_vm1, %v578_v43, %v582_v44  ;;  %v4384_v43 = vld [vmem:[%s5162_s17 + $0x194] ss:$8 sps:$4 sm:$0xff]   ;;  %p4559_p7 = scmp.ne.s32.totalorder %s5816_s15, %s4558_s14 }
  0xfe   : > { %p5990_p3 = scmp.ne.s32.totalorder %s5988_s27, 0 }
 0x100   : > { %3646 = vmatmul.mubr.msk.bf16.gmra.mrb[16].mxu0 %vm624_vm2, %v1666_v54  ;;  %v4370_v54 = vld [vmem:[%s5162_s17 + $0x94] ss:$8 sps:$4 sm:$0xff]   ;;  %s5821_s21 = scalar_lea.hbm %s5989_s7, %s3784_s18  ;;  %p4560_p9 = pnand %p4559_p7, %p5990_p3 }
 0x101   : > { %1997 = vmatprep.mubr.bf16.mxu0 %v4751_v0 }
 0x102   : > { %3542 = vmatmul.mubr.msk.bf16.gmra.mrb[16].mxu1 %vm624_vm2, %v551_v59  ;;  %v1891_v59 = vsel %vm1878_vm4, %v1888_v49, %v1890_v55  ;;  %v4382_v49 = vld [vmem:[%s5162_s17 + $0x190] ss:$8 sps:$4 sm:$0xff]   ;;  %p4561_p12 = pneg %p4560_p9 }
 0x103   : > { %734 = vmatprep.mubr.bf16.mxu1 %v4751_v0 }
 0x108   : > { %3668 = vmatmul.mubr.msk.bf16.vlgmr.msra.gmra.mrb[0].mxu0 %vm624_vm2, %v1881_v3 }
 0x109   : > { %2476 = vmatpush1.bf16.msra.mxu0 %v4341_v4  ;;  %2007 = vmatprep.mubr.bf16.mxu0 %v4751_v0  ;;  %v5416_v4 = vld [vmem:[#allocation2 + $0x48] sm:$0xff]  }
 0x10a   : > { %3543 = vmatmul.mubr.msk.bf16.gmra.mrb[20].mxu1 %vm624_vm2, %v559_v6  ;;  %2477 = vmatprep.subr.bf16.mxu0 %v4351_v5  ;;  %v1894_v5 = vrot.slane %v5416_v4, 2  ;;  %v2232_v6 = vld [vmem:[#allocation2 + $0x10] sm:$0xc] }
 0x10b   : > { %744 = vmatprep.mubr.bf16.mxu1 %v4751_v0 }
 0x10d   : > { %2478 = vmatpush1.bf16.msra.mxu0 %v4349_v9  ;;  %v5429_v9 = vld [vmem:[#allocation2 + $0x50] ss:$0 sps:$4 sm:$0x33]  }
 0x10e   : > { %2479 = vmatprep.subr.bf16.mxu0 %v4358_v10  ;;  %v5432_v10 = vcombine.low %v2232_v6, %v5423_v7  ;;  %v1896_v12 = vrot.slane %v5429_v9, 2 }
 0x110   : > { %3669 = vmatmul.mubr.msk.bf16.gmra.mrb[4].mxu0 %vm624_vm2, %v1883_v14  ;;  %v2320_v14 = vshrl.u32 %v5432_v10, 16  ;;  %v1897_v17 = vsel %vm1878_vm4, %v1894_v5, %v1896_v12 }
 0x111   : > { %2017 = vmatprep.mubr.bf16.mxu0 %v4751_v0  ;;  %2480 = vmatpush1.bf16.msra.mxu0 %v4356_v15  ;;  %v2323_v15 = vshll.u32 %v5432_v10, 16 }
 0x112   : > { %3544 = vmatmul.mubr.msk.bf16.gmra.mrb[24].mxu1 %vm624_vm2, %v567_v48  ;;  %2481 = vmatprep.subr.bf16.mxu0 %v4366_v16  ;;  %v2331_v16 = vshll.u32 %v5426_v39, 16  ;;  %v2330_v48 = vrot.slane %v2328_v11, 2  ;;  %v2322_v19 = vrot.slane %v2320_v14, 2 }
 0x113   : > { %754 = vmatprep.mubr.bf16.mxu1 %v4751_v0  ;;  %v2325_v20 = vrot.slane %v2323_v15, 3  ;;  %v956_v15 = vld [vmem:[#allocation2] sm:$0xe] }
 0x115   : > { %2482 = vmatpush1.bf16.msra.mxu0 %v4364_v21  ;;  %v2333_v21 = vrot.slane %v2331_v16, 3  ;;  %v2326_v24 = vor.u32 %v2325_v20, %v2322_v19  ;;  %v5493_v19 = vld [vmem:[#allocation2 + $0x40] sm:$0xff]   ;;  %v3572_v20 = vcombine.low %v956_v15, %v5213_v30 }
 0x116   : > { %2687 = vmatprep.subr.bf16.mxu0 %v4376_v23  ;;  %v5445_v23 = vld [vmem:[#allocation2 + $0x20] sm:$0xff]  }
 0x117   : > { %v2334_v25 = vor.u32 %v2333_v21, %v2330_v48  ;;  %v2337_v27 = vshrl.u32 %v5445_v23, 16 }
 0x118   : > { %3670 = vmatmul.mubr.msk.bf16.gmra.mrb[8].mxu0 %vm624_vm2, %v1885_v28  ;;  %v2340_v28 = vshll.u32 %v5445_v23, 16 }
 0x119   : > { %2027 = vmatprep.mubr.bf16.mxu0 %v4751_v0  ;;  %v2335_v29 = vsel %vm2318_vm5, %v2326_v24, %v2334_v25  ;;  %v2339_v35 = vrot.slane %v2337_v27, 2  ;;  %v2373_v24 = vshrl.u32 %v5493_v19, 16  ;;  %v970_v27 = vrot.slane %v3572_v20, 1 }
 0x11a   : > { %3545 = vmatmul.mubr.msk.bf16.gmra.mrb[28].mxu1 %vm624_vm2, %v575_v33  ;;  %v4374_v33 = vld [vmem:[%s5162_s17 + $0x180] ss:$8 sps:$4 sm:$0xff]   ;;  %v2342_v36 = vrot.slane %v2340_v28, 3  ;;  %v971_v28 = vrot.slane %v5219_v32, 1  ;;  %v977_v20 = vrot.slane %v5281_v18, 1 }
 0x11b   : > { %764 = vmatprep.mubr.bf16.mxu1 %v4751_v0 }
 0x11c   : > { %v2343_v44 = vor.u32 %v2342_v36, %v2339_v35  ;;  %v5505_v35 = vld [vmem:[#allocation2 + $0x48] sm:$0xff]   ;;  %v972_v36 = vsel %vm969_vm3, %v970_v27, %v971_v28 }
 0x120   : > { %3671 = vmatmul.mubr.msk.bf16.gmra.mrb[12].mxu0 %vm624_vm2, %v1887_v45  ;;  %v2346_v45 = vshrl.u32 %v5456_v40, 16 }
 0x121   : > { %2037 = vmatprep.mubr.bf16.mxu0 %v4751_v0 }
 0x122   : > { %3546 = vmatmul.mubr.msk.bf16.gmra.mrb[32].mxu1 %vm624_vm2, %v583_v46  ;;  %v2349_v46 = vshll.u32 %v5456_v40, 16 }
 0x123   : > { %865 = vmatprep.mubr.bf16.mxu1 %v4751_v0 }
 0x128   : > { %3672 = vmatmul.mubr.msk.bf16.gmra.mrb[16].mxu0 %vm624_vm2, %v1889_v50  ;;  %v4392_v50 = vld [vmem:[%s5162_s17 + $0x1a4] ss:$8 sps:$4 sm:$0xff]  }
 0x129   : > { %2047 = vmatprep.mubr.bf16.mxu0 %v4751_v0 }
 0x12a   : > { %3555 = vmatmul.mubr.msk.bf16.vlgmr.msra.gmra.mrb[0].mxu1 %vm624_vm2, %v5217_v31  ;;  %v1892_v31 = vrot.slane %v5403_v60, 2 }
 0x12b   : > { %875 = vmatprep.mubr.bf16.mxu1 %v4751_v0  ;;  %1057 = vmatpush1.bf16.msra.mxu1 %v4359_v53  ;;  %v2344_v53 = vsel %vm2318_vm5, %v2334_v25, %v2343_v44  ;;  %v2376_v25 = vshll.u32 %v5493_v19, 16 }
 0x12c   : > { %1058 = vmatprep.subr.bf16.mxu1 %v4370_v54  ;;  %v1893_v3 = vsel %vm1878_vm4, %v1890_v55, %v1892_v31  ;;  %v1895_v8 = vsel %vm1878_vm4, %v1892_v31, %v1894_v5  ;;  %v2348_v54 = vrot.slane %v2346_v45, 2  ;;  %v2351_v55 = vrot.slane %v2349_v46, 3 }
 0x12d   : > { %v2385_v46 = vshll.u32 %v5505_v35, 16 }
 0x12f   : > { %1059 = vmatpush1.bf16.msra.mxu1 %v4368_v57  ;;  %v5469_v57 = vld [vmem:[#allocation2 + $0x30] sm:$0xff]  }
 0x130   : > { %3673 = vmatmul.mubr.msk.bf16.gmra.mrb[20].mxu0 %vm624_vm2, %v1891_v59  ;;  %1060 = vmatprep.subr.bf16.mxu1 %v4379_v58  ;;  %v4390_v58 = vld [vmem:[%s5162_s17 + $0x1a0] ss:$8 sps:$4 sm:$0xff]   ;;  %v4400_v59 = vld [vmem:[%s5162_s17 + $0x1b4] ss:$8 sps:$4 sm:$0xff]   ;;  %v2358_v31 = vshll.u32 %v5469_v57, 16 }
 0x131   : > { %2057 = vmatprep.mubr.bf16.mxu0 %v4751_v0 }
 0x132   : > { %3556 = vmatmul.mubr.msk.bf16.gmra.mrb[4].mxu1 %vm624_vm2, %v5219_v32  ;;  %v2360_v6 = vrot.slane %v2358_v31, 3  ;;  %v2382_v32 = vshrl.u32 %v5505_v35, 16  ;;  %v4417_v31 = vld [vmem:[%s5162_s17 + $0x134] ss:$8 sps:$4 sm:$0xff]  }
 0x133   : > { %885 = vmatprep.mubr.bf16.mxu1 %v4751_v0  ;;  %1061 = vmatpush1.bf16.msra.mxu1 %v4377_v61  ;;  %v2352_v61 = vor.u32 %v2351_v55, %v2348_v54 }
 0x134   : > { %1062 = vmatprep.subr.bf16.mxu1 %v4387_v34  ;;  %v2355_v34 = vshrl.u32 %v5469_v57, 16  ;;  %v2384_v55 = vrot.slane %v2382_v32, 2 }
 0x136   : > { %v2357_v5 = vrot.slane %v2355_v34, 2  ;;  %v4409_v34 = vld [vmem:[%s5162_s17 + $0x120] ss:$8 sps:$4 sm:$0xff]  }
 0x137   : > { %1063 = vmatpush1.bf16.msra.mxu1 %v4385_v62  ;;  %v4398_v62 = vld [vmem:[%s5162_s17 + $0x1b0] ss:$8 sps:$4 sm:$0xff]  }
 0x138   : > { %3674 = vmatmul.mubr.msk.bf16.gmra.mrb[24].mxu0 %vm624_vm2, %v1893_v3  ;;  %1530 = vmatprep.subr.bf16.mxu1 %v4395_v63  ;;  %v4408_v63 = vld [vmem:[%s5162_s17 + $0x204] ss:$8 sps:$4 sm:$0xff]   ;;  %v2353_v3 = vsel %vm2318_vm5, %v2343_v44, %v2352_v61  ;;  %v2361_v11 = vor.u32 %v2360_v6, %v2357_v5  ;;  %v4404_v44 = vld [vmem:[%s5162_s17 + $0x114] ss:$8 sps:$4 sm:$0xff]   ;;  %v4415_v5 = vld [vmem:[%s5162_s17 + $0x130] ss:$8 sps:$4 sm:$0xff]  }
 0x139   : > { %2067 = vmatprep.mubr.bf16.mxu0 %v4751_v0 }
 0x13a   : > { %3557 = vmatmul.mubr.msk.bf16.gmra.mrb[8].mxu1 %vm624_vm2, %v5232_v41  ;;  %v2362_v16 = vsel %vm2318_vm5, %v2352_v61, %v2361_v11 }
 0x13b   : > { %895 = vmatprep.mubr.bf16.mxu1 %v4751_v0 }
 0x140   : > { %3675 = vmatmul.mubr.msk.bf16.gmra.mrb[28].mxu0 %vm624_vm2, %v1895_v8  ;;  %v5483_v8 = vld [vmem:[#allocation2 + $0x38] sm:$0xff]  }
 0x141   : > { %2077 = vmatprep.mubr.bf16.mxu0 %v4751_v0  ;;  %v2364_v12 = vshrl.u32 %v5483_v8, 16  ;;  %v2367_v14 = vshll.u32 %v5483_v8, 16 }
 0x142   : > { %3558 = vmatmul.mubr.msk.bf16.gmra.mrb[12].mxu1 %vm624_vm2, %v5248_v56 }
 0x143   : > { %905 = vmatprep.mubr.bf16.mxu1 %v4751_v0  ;;  %v2366_v48 = vrot.slane %v2364_v12, 2 }
 0x148   : > { %3676 = vmatmul.mubr.msk.bf16.gmra.mrb[32].mxu0 %vm624_vm2, %v1897_v17  ;;  %v2369_v17 = vrot.slane %v2367_v14, 3  ;;  %v5534_v14 = vld [vmem:[#allocation2 + $0x58] ss:$0 sps:$4 sm:$0x77]  }
 0x149   : > { %2507 = vmatprep.mubr.bf16.mxu0 %v4751_v0 }
 0x14a   : > { %3559 = vmatmul.mubr.msk.bf16.gmra.mrb[16].mxu1 %vm624_vm2, %v5281_v18  ;;  %v2370_v21 = vor.u32 %v2369_v17, %v2366_v48  ;;  %v2403_v17 = vshll.u32 %v5534_v14, 16 }
 0x14b   : > { %915 = vmatprep.mubr.bf16.mxu1 %v4751_v0 }
 0x14c   : > { %v2371_v30 = vsel %vm2318_vm5, %v2361_v11, %v2370_v21 }
 0x150   : > { %3711 = vmatmul.mubr.msk.bf16.vlgmr.msra.gmra.mrb[0].mxu0 %vm624_vm2, %v2335_v29  ;;  %v2375_v29 = vrot.slane %v2373_v24, 2 }
 0x151   : > { %2688 = vmatpush1.bf16.msra.mxu0 %v4374_v33  ;;  %2517 = vmatprep.mubr.bf16.mxu0 %v4751_v0  ;;  %v2378_v33 = vrot.slane %v2376_v25, 3  ;;  %v2405_v25 = vrot.slane %v2403_v17, 3 }
 0x152   : > { %3560 = vmatmul.mubr.msk.bf16.gmra.mrb[20].mxu1 %vm624_vm2, %v5304_v37  ;;  %2689 = vmatprep.subr.bf16.mxu0 %v4384_v43  ;;  %v4393_v43 = vld [vmem:[%s5162_s17 + $0x100] ss:$8 sps:$4 sm:$0xff]  }
 0x153   : > { %925 = vmatprep.mubr.bf16.mxu1 %v4751_v0  ;;  %v2379_v45 = vor.u32 %v2378_v33, %v2375_v29  ;;  %v2601_v33 = vrot.slane %v5432_v10, 2  ;;  %v2604_v10 = vrot.slane %v5445_v23, 2 }
 0x155   : > { %2690 = vmatpush1.bf16.msra.mxu0 %v4382_v49  ;;  %v973_v49 = vrot.slane %v5232_v41, 1  ;;  %v2380_v54 = vsel %vm2318_vm5, %v2370_v21, %v2379_v45 }
 0x156   : > { %2691 = vmatprep.subr.bf16.mxu0 %v4392_v50  ;;  %v4402_v50 = vld [vmem:[%s5162_s17 + $0x110] ss:$8 sps:$4 sm:$0xff]  }
 0x157   : > { %v974_v61 = vsel %vm969_vm3, %v971_v28, %v973_v49 }
 0x158   : > { %3712 = vmatmul.mubr.msk.bf16.gmra.mrb[4].mxu0 %vm624_vm2, %v2344_v53  ;;  %v4411_v53 = vld [vmem:[%s5162_s17 + $0x124] ss:$8 sps:$4 sm:$0xff]  }
 0x159   : > { %2527 = vmatprep.mubr.bf16.mxu0 %v4751_v0  ;;  %2692 = vmatpush1.bf16.msra.mxu0 %v4390_v58  ;;  %v2387_v58 = vrot.slane %v2385_v46, 3  ;;  %v4412_v46 = vld [vmem:[%s5162_s17 + $0x210] ss:$8 sps:$4 sm:$0xff]  }
 0x15a   : > { %3561 = vmatmul.mubr.msk.bf16.gmra.mrb[24].mxu1 %vm624_vm2, %v5319_v52  ;;  %2693 = vmatprep.subr.bf16.mxu0 %v4400_v59  ;;  %v5520_v59 = vld [vmem:[#allocation2 + $0x50] sm:$0xff]  }
 0x15b   : > { %935 = vmatprep.mubr.bf16.mxu1 %v4751_v0  ;;  %v2388_v41 = vor.u32 %v2387_v58, %v2384_v55  ;;  %v2606_v58 = vrot.slane %v5456_v40, 2 }
 0x15d   : > { %2694 = vmatpush1.bf16.msra.mxu0 %v4398_v62  ;;  %v2391_v62 = vshrl.u32 %v5520_v59, 16  ;;  %v2389_v6 = vsel %vm2318_vm5, %v2379_v45, %v2388_v41  ;;  %v4414_v45 = vld [vmem:[%s5162_s17 + $0x214] ss:$8 sps:$4 sm:$0xff]  }
 0x15e   : > { %2910 = vmatprep.subr.bf16.mxu0 %v4408_v63  ;;  %v2394_v63 = vshll.u32 %v5520_v59, 16 }
 0x15f   : > { %v2393_v11 = vrot.slane %v2391_v62, 2  ;;  %v987_v62 = vrot.slane %v5367_v26, 1  ;;  %v2610_v26 = vrot.slane %v5483_v8, 2 }
 0x160   : > { %3713 = vmatmul.mubr.msk.bf16.gmra.mrb[8].mxu0 %vm624_vm2, %v2353_v3  ;;  %v975_v3 = vrot.slane %v5248_v56, 1  ;;  %v2396_v12 = vrot.slane %v2394_v63, 3  ;;  %v2400_v56 = vshrl.u32 %v5534_v14, 16  ;;  %v1375_v63 = vshrl.u32 %v5227_v38, 16 }
 0x161   : > { %2537 = vmatprep.mubr.bf16.mxu0 %v4751_v0 }
 0x162   : > { %3562 = vmatmul.mubr.msk.bf16.gmra.mrb[28].mxu1 %vm624_vm2, %v5337_v1  ;;  %v976_v15 = vsel %vm969_vm3, %v973_v49, %v975_v3  ;;  %v2397_v48 = vor.u32 %v2396_v12, %v2393_v11  ;;  %v2402_v24 = vrot.slane %v2400_v56, 2  ;;  %v978_v27 = vsel %vm969_vm3, %v975_v3, %v977_v20  ;;  %v4427_v3 = vld [vmem:[#allocation2 + $0x10] sm:$0xff]  }
 0x163   : > { %945 = vmatprep.mubr.bf16.mxu1 %v4751_v0  ;;  %v983_v49 = vrot.slane %v5337_v1, 1  ;;  %v985_v1 = vrot.slane %v5352_v13, 1 }
 0x164   : > { %v2398_v21 = vsel %vm2318_vm5, %v2388_v41, %v2397_v48  ;;  %v2406_v28 = vor.u32 %v2405_v25, %v2402_v24  ;;  %v2608_v41 = vrot.slane %v5469_v57, 2 }
 0x165   : > { %v988_v12 = vsel %vm969_vm3, %v985_v1, %v987_v62  ;;  %v2616_v62 = vrot.slane %v5520_v59, 2 }
 0x166   : > { %v2407_v18 = vsel %vm2318_vm5, %v2397_v48, %v2406_v28  ;;  %v2609_v11 = vsel %vm1878_vm4, %v2606_v58, %v2608_v41  ;;  %v2611_v25 = vsel %vm1878_vm4, %v2608_v41, %v2610_v26  ;;  %v4436_v41 = vld [vmem:[%s5162_s17 + $0xf0] ss:$8 sps:$4 sm:$0xff]  }
 0x168   : > { %3714 = vmatmul.mubr.msk.bf16.gmra.mrb[12].mxu0 %vm624_vm2, %v2362_v16  ;;  %v4426_v16 = vld [vmem:[%s5162_s17 + $0xc4] ss:$8 sps:$4 sm:$0xff]  }
 0x169   : > { %2547 = vmatprep.mubr.bf16.mxu0 %v4751_v0 }
 0x16a   : > { %3563 = vmatmul.mubr.msk.bf16.gmra.mrb[32].mxu1 %vm624_vm2, %v5352_v13  ;;  %v1378_v13 = vshll.u32 %v5227_v38, 16 }
 0x16b   : > { %1088 = vmatprep.mubr.bf16.mxu1 %v4751_v0 }
 0x170   : > { %3715 = vmatmul.mubr.msk.bf16.gmra.mrb[16].mxu0 %vm624_vm2, %v2371_v30  ;;  %v979_v30 = vrot.slane %v5304_v37, 1  ;;  %v981_v37 = vrot.slane %v5319_v52, 1  ;;  %v4420_v52 = vld [vmem:[%s5162_s17 + $0x224] ss:$8 sps:$4 sm:$0xff]  }
 0x171   : > { %2557 = vmatprep.mubr.bf16.mxu0 %v4751_v0 }
 0x172   : > { %3581 = vmatmul.mubr.msk.bf16.vlgmr.msra.gmra.mrb[0].mxu1 %vm624_vm2, %v972_v36  ;;  %v980_v29 = vsel %vm969_vm3, %v977_v20, %v979_v30  ;;  %v2602_v36 = vrot.slane %v5426_v39, 2  ;;  %v982_v32 = vsel %vm969_vm3, %v979_v30, %v981_v37  ;;  %v984_v55 = vsel %vm969_vm3, %v981_v37, %v983_v49  ;;  %v4428_v20 = vld [vmem:[#allocation2 + $0x18] sm:$0xff]   ;;  %v4430_v37 = vld [vmem:[#allocation2 + $0x20] sm:$0xff]  }
 0x173   : > { %1098 = vmatprep.mubr.bf16.mxu1 %v4751_v0  ;;  %1531 = vmatpush1.bf16.msra.mxu1 %v4393_v43  ;;  %v1395_v24 = vshll.u32 %v4428_v20, 16 }
 0x174   : > { %1532 = vmatprep.subr.bf16.mxu1 %v4404_v44  ;;  %v2603_v43 = vsel %vm1878_vm4, %v2601_v33, %v2602_v36  ;;  %v4406_v44 = vld [vmem:[%s5162_s17 + $0x200] ss:$8 sps:$4 sm:$0xff]  }
 0x175   : > { %v1397_v30 = vrot.slane %v1395_v24, 2  ;;  %v4429_v33 = vld [vmem:[%s5162_s17 + $0xc0] ss:$8 sps:$4 sm:$0xff]  }
 0x177   : > { %1533 = vmatpush1.bf16.msra.mxu1 %v4402_v50  ;;  %v2605_v50 = vsel %vm1878_vm4, %v2602_v36, %v2604_v10  ;;  %v1401_v36 = vshrl.u32 %v5260_v2, 16  ;;  %v2614_v2 = vrot.slane %v5505_v35, 2 }
 0x178   : > { %3716 = vmatmul.mubr.msk.bf16.gmra.mrb[20].mxu0 %vm624_vm2, %v2380_v54  ;;  %1534 = vmatprep.subr.bf16.mxu1 %v4411_v53  ;;  %v4418_v53 = vld [vmem:[%s5162_s17 + $0x220] ss:$8 sps:$4 sm:$0xff]   ;;  %v4423_v54 = vld [vmem:[%s5162_s17 + $0x234] ss:$8 sps:$4 sm:$0xff]  }
 0x179   : > { %2567 = vmatprep.mubr.bf16.mxu0 %v4751_v0 }
 0x17a   : > { %3582 = vmatmul.mubr.msk.bf16.gmra.mrb[4].mxu1 %vm624_vm2, %v974_v61  ;;  %v4421_v61 = vld [vmem:[%s5162_s17 + $0x230] ss:$8 sps:$4 sm:$0xff]  }
 0x17b   : > { %1108 = vmatprep.mubr.bf16.mxu1 %v4751_v0  ;;  %1535 = vmatpush1.bf16.msra.mxu1 %v4409_v34  ;;  %v2607_v34 = vsel %vm1878_vm4, %v2604_v10, %v2606_v58  ;;  %v1403_v10 = vrot.slane %v1401_v36, 1  ;;  %v4435_v58 = vld [vmem:[%s5162_s17 + $0xf4] ss:$8 sps:$4 sm:$0xff]  }
 0x17c   : > { %1536 = vmatprep.subr.bf16.mxu1 %v4417_v31  ;;  %v986_v31 = vsel %vm969_vm3, %v983_v49, %v985_v1  ;;  %v4433_v49 = vld [vmem:[%s5162_s17 + $0xe4] ss:$8 sps:$4 sm:$0xff]  }
 0x17f   : > { %1537 = vmatpush1.bf16.msra.mxu1 %v4415_v5  ;;  %v1383_v5 = vshrl.u32 %v4427_v3, 16 }
 0x180   : > { %3717 = vmatmul.mubr.msk.bf16.gmra.mrb[24].mxu0 %vm624_vm2, %v2389_v6  ;;  %3809 = vmatprep.subr.bf16.mxu1 %v4426_v16  ;;  %v1386_v6 = vshll.u32 %v4427_v3, 16  ;;  %v1380_v16 = vrot.slane %v1378_v13, 2  ;;  %v1422_v13 = vshll.u32 %v5308_v42, 16  ;;  %v2617_v3 = vsel %vm1878_vm4, %v2614_v2, %v2616_v62 }
 0x181   : > { %2577 = vmatprep.mubr.bf16.mxu0 %v4751_v0  ;;  %v1385_v48 = vrot.slane %v1383_v5, 1  ;;  %v4424_v5 = vld [vmem:[#allocation2 + $0x58] ss:$0 sps:$4 sm:$0x33]  }
 0x182   : > { %3583 = vmatmul.mubr.msk.bf16.gmra.mrb[8].mxu1 %vm624_vm2, %v976_v15  ;;  %v1377_v15 = vrot.slane %v1375_v63, 1  ;;  %v1388_v56 = vrot.slane %v1386_v6, 2  ;;  %v1419_v63 = vshrl.u32 %v5308_v42, 16  ;;  %v2837_v42 = vrot.slane %v5505_v35, 3 }
 0x183   : > { %1118 = vmatprep.mubr.bf16.mxu1 %v4751_v0 }
 0x184   : > { %v1381_v38 = vor.u32 %v1380_v16, %v1377_v15  ;;  %v1389_v17 = vor.u32 %v1388_v56, %v1385_v48  ;;  %v2618_v15 = vrot.slane %v4424_v5, 2  ;;  %v2810_v16 = vld [vmem:[#allocation2 + $0x10] sm:$0x8]  ;;  %v1428_v56 = vshrl.u32 %v5390_v51, 16 }
 0x188   : > { %3718 = vmatmul.mubr.msk.bf16.gmra.mrb[28].mxu0 %vm624_vm2, %v2398_v21  ;;  %v1392_v21 = vshrl.u32 %v4428_v20, 16 }
 0x189   : > { %2587 = vmatprep.mubr.bf16.mxu0 %v4751_v0 }
 0x18a   : > { %3584 = vmatmul.mubr.msk.bf16.gmra.mrb[12].mxu1 %vm624_vm2, %v978_v27  ;;  %v1390_v27 = vsel %vm1373_vm6, %v1381_v38, %v1389_v17  ;;  %v1394_v28 = vrot.slane %v1392_v21, 1  ;;  %v2619_v38 = vsel %vm1878_vm4, %v2616_v62, %v2618_v15  ;;  %v1430_v21 = vrot.slane %v1428_v56, 1 }
 0x18b   : > { %1128 = vmatprep.mubr.bf16.mxu1 %v4751_v0 }
 0x190   : > { %3719 = vmatmul.mubr.msk.bf16.gmra.mrb[32].mxu0 %vm624_vm2, %v2407_v18  ;;  %v2612_v18 = vrot.slane %v5493_v19, 2 }
 0x191   : > { %2719 = vmatprep.mubr.bf16.mxu0 %v4751_v0 }
 0x192   : > { %3585 = vmatmul.mubr.msk.bf16.gmra.mrb[16].mxu1 %vm624_vm2, %v980_v29  ;;  %v1398_v29 = vor.u32 %v1397_v30, %v1394_v28  ;;  %v1437_v30 = vshrl.u32 %v5403_v60, 16 }
 0x193   : > { %1138 = vmatprep.mubr.bf16.mxu1 %v4751_v0 }
 0x198   : > { %3729 = vmatmul.mubr.msk.bf16.vlgmr.msra.gmra.mrb[0].mxu0 %vm624_vm2, %v2603_v43  ;;  %v1404_v43 = vshll.u32 %v4430_v37, 16 }
 0x199   : > { %2911 = vmatpush1.bf16.msra.mxu0 %v4406_v44  ;;  %2729 = vmatprep.mubr.bf16.mxu0 %v4751_v0  ;;  %v4431_v44 = vld [vmem:[%s5162_s17 + $0xd4] ss:$8 sps:$4 sm:$0xff]  }
 0x19a   : > { %3586 = vmatmul.mubr.msk.bf16.gmra.mrb[20].mxu1 %vm624_vm2, %v982_v32  ;;  %2912 = vmatprep.subr.bf16.mxu0 %v4414_v45  ;;  %v2613_v45 = vsel %vm1878_vm4, %v2610_v26, %v2612_v18  ;;  %v1399_v32 = vsel %vm1373_vm6, %v1389_v17, %v1398_v29  ;;  %v1431_v26 = vshll.u32 %v5390_v51, 16  ;;  %v3746_v17 = vcombine.low %v2810_v16, %v5423_v7 }
 0x19b   : > { %1148 = vmatprep.mubr.bf16.mxu1 %v4751_v0  ;;  %v1440_v7 = vshll.u32 %v5403_v60, 16 }
 0x19c   : > { %v1433_v24 = vrot.slane %v1431_v26, 2 }
 0x19d   : > { %2913 = vmatpush1.bf16.msra.mxu0 %v4412_v46  ;;  %v1406_v46 = vrot.slane %v1404_v43, 2  ;;  %v1442_v36 = vrot.slane %v1440_v7, 2  ;;  %v1446_v43 = vshrl.u32 %v5416_v4, 16 }
 0x19e   : > { %2914 = vmatprep.subr.bf16.mxu0 %v4420_v52  ;;  %v4432_v52 = vld [vmem:[%s5162_s17 + $0xd0] ss:$8 sps:$4 sm:$0xff]   ;;  %v1434_v28 = vor.u32 %v1433_v24, %v1430_v21  ;;  %v3107_v21 = vlaneseq }
 0x1a0   : > { %3730 = vmatmul.mubr.msk.bf16.gmra.mrb[4].mxu0 %vm624_vm2, %v2605_v50  ;;  %v1407_v50 = vor.u32 %v1406_v46, %v1403_v10  ;;  %v1448_v10 = vrot.slane %v1446_v43, 1 }
 0x1a1   : > { %2739 = vmatprep.mubr.bf16.mxu0 %v4751_v0  ;;  %2915 = vmatpush1.bf16.msra.mxu0 %v4418_v53  ;;  %v1410_v53 = vshrl.u32 %v5287_v22, 16 }
 0x1a2   : > { %3587 = vmatmul.mubr.msk.bf16.gmra.mrb[24].mxu1 %vm624_vm2, %v984_v55  ;;  %2916 = vmatprep.subr.bf16.mxu0 %v4423_v54  ;;  %v1413_v54 = vshll.u32 %v5287_v22, 16  ;;  %v4434_v55 = vld [vmem:[%s5162_s17 + $0xe0] ss:$8 sps:$4 sm:$0xff]   ;;  %v1408_v1 = vsel %vm1373_vm6, %v1398_v29, %v1407_v50  ;;  %s4752_s17 = smov [#allocation12]  }
 0x1a3   : > { %1158 = vmatprep.mubr.bf16.mxu1 %v4751_v0  ;;  %s4562_s6 = sshll.u32 %s4752_s17, 4  ;;  %s4563_s6 = int_to_ptr.vmem [resolvable:$false] %s4562_s6 }
 0x1a4   : > { %s4564_s24 = scalar_lea.vmem %s4563_s6, 4608  ;;  %p4565_p0 = scmp.lt.s32.totalorder %s5816_s15, %s4563_s6 }
 0x1a5   : > { %2917 = vmatpush1.bf16.msra.mxu0 %v4421_v61  ;;  %v2615_v61 = vsel %vm1878_vm4, %v2612_v18, %v2614_v2  ;;  %v1458_v2 = vshll.u32 %v5429_v9, 16  ;;  %p4566_p11 = scmp.lt.s32.totalorder %s4564_s24, %s4558_s14 }
 0x1a7   : > { %p4567_p2 = por %p4566_p11, %p4565_p0 }
 0x1a8   : > { %3731 = vmatmul.mubr.msk.bf16.gmra.mrb[8].mxu0 %vm624_vm2, %v2607_v34  ;;  %v1412_v34 = vrot.slane %v1410_v53, 1 }
 0x1a9   : > { %2749 = vmatprep.mubr.bf16.mxu0 %v4751_v0  ;;  %p4568_p6 = pnand %p4567_p2, %p4561_p12 }
 0x1aa   : > { %3588 = vmatmul.mubr.msk.bf16.gmra.mrb[28].mxu1 %vm624_vm2, %v986_v31  ;;  %v1415_v31 = vrot.slane %v1413_v54, 2 }
 0x1ab   : > { %1168 = vmatprep.mubr.bf16.mxu1 %v4751_v0 }
 0x1ac   : > { %v1416_v22 = vor.u32 %v1415_v31, %v1412_v34 }
 0x1ae   : > { %v1417_v6 = vsel %vm1373_vm6, %v1407_v50, %v1416_v22 }
 0x1b0   : > { %3732 = vmatmul.mubr.msk.bf16.gmra.mrb[12].mxu0 %vm624_vm2, %v2609_v11  ;;  %v1421_v11 = vrot.slane %v1419_v63, 1  ;;  %v2839_v63 = vrot.slane %v5520_v59, 3 }
 0x1b1   : > { %2759 = vmatprep.mubr.bf16.mxu0 %v4751_v0 }
 0x1b2   : > { %3589 = vmatmul.mubr.msk.bf16.gmra.mrb[32].mxu1 %vm624_vm2, %v988_v12  ;;  %v1424_v12 = vrot.slane %v1422_v13, 2  ;;  %v2840_v13 = vsel %vm2823_vm7, %v2837_v42, %v2839_v63 }
 0x1b3   : > { %1562 = vmatprep.mubr.bf16.mxu1 %v4751_v0 }
 0x1b4   : > { %v1425_v48 = vor.u32 %v1424_v12, %v1421_v11 }
 0x1b6   : > { %v1426_v20 = vsel %vm1373_vm6, %v1416_v22, %v1425_v48  ;;  %v1435_v29 = vsel %vm1373_vm6, %v1425_v48, %v1434_v28  ;;  %v4425_v22 = vld [vmem:[#allocation2 + $0x50] ss:$0 sps:$4 sm:$0x11]  }
 0x1b7   : > { %v1673_v35 = vrot.slane %v4425_v22, 1 }
 0x1b8   : > { %3733 = vmatmul.mubr.msk.bf16.gmra.mrb[16].mxu0 %vm624_vm2, %v2611_v25  ;;  %v2824_v25 = vrot.slane %v3746_v17, 3 }
 0x1b9   : > { %2769 = vmatprep.mubr.bf16.mxu0 %v4751_v0 }
 0x1ba   : > { %3624 = vmatmul.mubr.msk.bf16.vlgmr.msra.gmra.mrb[0].mxu1 %vm624_vm2, %v1390_v27  ;;  %v2825_v27 = vrot.slane %v5426_v39, 3  ;;  %v2827_v39 = vrot.slane %v5445_v23, 3  ;;  %v2829_v23 = vrot.slane %v5456_v40, 3  ;;  %v2831_v40 = vrot.slane %v5469_v57, 3 }
 0x1bb   : > { %1572 = vmatprep.mubr.bf16.mxu1 %v4751_v0  ;;  %3813 = vmatpush1.bf16.msra.mxu1 %v4429_v33  ;;  %v1439_v33 = vrot.slane %v1437_v30, 1  ;;  %v1667_v57 = vrot.slane %v5390_v51, 1 }
 0x1bc   : > { %3810 = vmatprep.subr.bf16.mxu1 %v4431_v44  ;;  %v2826_v18 = vsel %vm2823_vm7, %v2824_v25, %v2825_v27  ;;  %v1449_v44 = vshll.u32 %v5416_v4, 16  ;;  %v2830_v50 = vsel %vm2823_vm7, %v2827_v39, %v2829_v23 }
 0x1bd   : > { %v1443_v37 = vor.u32 %v1442_v36, %v1439_v33  ;;  %v1668_v31 = vsel %vm969_vm3, %v1665_v47, %v1667_v57  ;;  %v1671_v47 = vrot.slane %v5416_v4, 1 }
 0x1be   : > { %v1451_v46 = vrot.slane %v1449_v44, 2 }
 0x1bf   : > { %3814 = vmatpush1.bf16.msra.mxu1 %v4432_v52  ;;  %v1674_v4 = vsel %vm969_vm3, %v1671_v47, %v1673_v35 }
 0x1c0   : > { %3734 = vmatmul.mubr.msk.bf16.gmra.mrb[20].mxu0 %vm624_vm2, %v2613_v45  ;;  %3811 = vmatprep.subr.bf16.mxu1 %v4433_v49  ;;  %v2828_v45 = vsel %vm2823_vm7, %v2825_v27, %v2827_v39  ;;  %v1452_v52 = vor.u32 %v1451_v46, %v1448_v10  ;;  %v1455_v49 = vshrl.u32 %v5429_v9, 16  ;;  %v3108_v27 = vshrl.u32 %v3107_v21, 7 }
 0x1c1   : > { %2779 = vmatprep.mubr.bf16.mxu0 %v4751_v0 }
 0x1c2   : > { %3625 = vmatmul.mubr.msk.bf16.gmra.mrb[4].mxu1 %vm624_vm2, %v1399_v32  ;;  %v1444_v32 = vsel %vm1373_vm6, %v1434_v28, %v1443_v37  ;;  %v1453_v53 = vsel %vm1373_vm6, %v1443_v37, %v1452_v52  ;;  %v1457_v54 = vrot.slane %v1455_v49, 1  ;;  %v3109_v7 = vsub.s32 0, %v3108_v27 }
 0x1c3   : > { %1582 = vmatprep.mubr.bf16.mxu1 %v4751_v0  ;;  %3815 = vmatpush1.bf16.msra.mxu1 %v4434_v55  ;;  %v1460_v55 = vrot.slane %v1458_v2, 2  ;;  %v3113_v33 = vsub.s32 1, %v3108_v27 }
 0x1c4   : > { %3812 = vmatprep.subr.bf16.mxu1 %v4435_v58 }
 0x1c5   : > { %v1461_v58 = vor.u32 %v1460_v55, %v1457_v54 }
 0x1c7   : > { %3816 = vmatpush1.bf16.msra.mxu1 %v4436_v41  ;;  %v1462_v9 = vsel %vm1373_vm6, %v1452_v52, %v1461_v58  ;;  %v2835_v41 = vrot.slane %v5493_v19, 3 }
 0x1c8   : > { %3735 = vmatmul.mubr.msk.bf16.gmra.mrb[24].mxu0 %vm624_vm2, %v2615_v61  ;;  %v2832_v61 = vsel %vm2823_vm7, %v2829_v23, %v2831_v40 }
 0x1c9   : > { %2789 = vmatprep.mubr.bf16.mxu0 %v4751_v0  ;;  %v2838_v19 = vsel %vm2823_vm7, %v2835_v41, %v2837_v42 }
 0x1ca   : > { %3626 = vmatmul.mubr.msk.bf16.gmra.mrb[8].mxu1 %vm624_vm2, %v1408_v1  ;;  %v2833_v1 = vrot.slane %v5483_v8, 3  ;;  %v1669_v8 = vrot.slane %v5403_v60, 1 }
 0x1cb   : > { %1592 = vmatprep.mubr.bf16.mxu1 %v4751_v0 }
 0x1cc   : > { %v2834_v34 = vsel %vm2823_vm7, %v2831_v40, %v2833_v1  ;;  %v2836_v51 = vsel %vm2823_vm7, %v2833_v1, %v2835_v41  ;;  %v1670_v62 = vsel %vm969_vm3, %v1667_v57, %v1669_v8  ;;  %v1672_v60 = vsel %vm969_vm3, %v1669_v8, %v1671_v47 }
 0x1d0   : > { %3736 = vmatmul.mubr.msk.bf16.gmra.mrb[28].mxu0 %vm624_vm2, %v2617_v3  ;;  %v2841_v3 = vrot.slane %v5534_v14, 3 }
 0x1d1   : > { %2799 = vmatprep.mubr.bf16.mxu0 %v4751_v0 }
 0x1d2   : > { %3627 = vmatmul.mubr.msk.bf16.gmra.mrb[12].mxu1 %vm624_vm2, %v1417_v6  ;;  %v2842_v5 = vsel %vm2823_vm7, %v2839_v63, %v2841_v3 }
 0x1d3   : > { %1602 = vmatprep.mubr.bf16.mxu1 %v4751_v0 }
 0x1d8   : > { %3737 = vmatmul.mubr.msk.bf16.gmra.mrb[32].mxu0 %vm624_vm2, %v2619_v38 }
 0x1d9   : > { %2942 = vmatprep.mubr.bf16.mxu0 %v4751_v0 }
 0x1da   : > { %3628 = vmatmul.mubr.msk.bf16.gmra.mrb[16].mxu1 %vm624_vm2, %v1426_v20 }
 0x1db   : > { %1612 = vmatprep.mubr.bf16.mxu1 %v4751_v0 }
 0x1e0   : > { %3755 = vmatmul.mubr.msk.bf16.vlgmr.msra.gmra.mrb[0].mxu0 %vm624_vm2, %v2826_v18 }
 0x1e1   : > { %2952 = vmatprep.mubr.bf16.mxu0 %v4751_v0 }
 0x1e2   : > { %3629 = vmatmul.mubr.msk.bf16.gmra.mrb[20].mxu1 %vm624_vm2, %v1435_v29  ;;  %v3105_v29 = vld [vmem:[%s5168_s9] sm:$0x3] }
 0x1e3   : > { %1622 = vmatprep.mubr.bf16.mxu1 %v4751_v0  ;;  %v5741_v39 = vrot.slane %v3105_v29, %v3109_v7  ;;  %v5744_v43 = vrot.slane %v3105_v29, %v3113_v33 }
 0x1e8   : > { %3756 = vmatmul.mubr.msk.bf16.gmra.mrb[4].mxu0 %vm624_vm2, %v2828_v45 }
 0x1e9   : > { %2962 = vmatprep.mubr.bf16.mxu0 %v4751_v0 }
 0x1ea   : > { %3630 = vmatmul.mubr.msk.bf16.gmra.mrb[24].mxu1 %vm624_vm2, %v1444_v32 }
 0x1eb   : > { %1632 = vmatprep.mubr.bf16.mxu1 %v4751_v0 }
 0x1f0   : > { %3757 = vmatmul.mubr.msk.bf16.gmra.mrb[8].mxu0 %vm624_vm2, %v2830_v50 }
 0x1f1   : > { %2972 = vmatprep.mubr.bf16.mxu0 %v4751_v0 }
 0x1f2   : > { %3631 = vmatmul.mubr.msk.bf16.gmra.mrb[28].mxu1 %vm624_vm2, %v1453_v53 }
 0x1f3   : > { %1642 = vmatprep.mubr.bf16.mxu1 %v4751_v0 }
 0x1f8   : > { %3758 = vmatmul.mubr.msk.bf16.gmra.mrb[12].mxu0 %vm624_vm2, %v2832_v61 }
 0x1f9   : > { %2982 = vmatprep.mubr.bf16.mxu0 %v4751_v0 }
 0x1fa   : > { %3632 = vmatmul.mubr.msk.bf16.gmra.mrb[32].mxu1 %vm624_vm2, %v1462_v9 }
 0x1fb   : > { %1824 = vmatprep.mubr.bf16.mxu1 %v4751_v0 }
 0x200   : > { %3759 = vmatmul.mubr.msk.bf16.gmra.mrb[16].mxu0 %vm624_vm2, %v2834_v34 }
 0x201   : > { %2992 = vmatprep.mubr.bf16.mxu0 %v4751_v0 }
 0x202   : > { %3647 = vmatmul.mubr.msk.bf16.vlgmr.msra.gmra.mrb[20].mxu1 %vm624_vm2, %v1668_v31 }
 0x203   : > { %1834 = vmatprep.mubr.bf16.mxu1 %v4751_v0 }
 0x208   : > { %3760 = vmatmul.mubr.msk.bf16.gmra.mrb[20].mxu0 %vm624_vm2, %v2836_v51 }
 0x209   : > { %3002 = vmatprep.mubr.bf16.mxu0 %v4751_v0 }
 0x20a   : > { %3648 = vmatmul.mubr.msk.bf16.gmra.mrb[24].mxu1 %vm624_vm2, %v1670_v62 }
 0x20b   : > { %1844 = vmatprep.mubr.bf16.mxu1 %v4751_v0 }
 0x210   : > { %3761 = vmatmul.mubr.msk.bf16.gmra.mrb[24].mxu0 %vm624_vm2, %v2838_v19 }
 0x211   : > { %3012 = vmatprep.mubr.bf16.mxu0 %v4751_v0 }
 0x212   : > { %3649 = vmatmul.mubr.msk.bf16.gmra.mrb[28].mxu1 %vm624_vm2, %v1672_v60 }
 0x213   : > { %1854 = vmatprep.mubr.bf16.mxu1 %v4751_v0 }
 0x218   : > { %3762 = vmatmul.mubr.msk.bf16.gmra.mrb[28].mxu0 %vm624_vm2, %v2840_v13 }
 0x219   : > { %3022 = vmatprep.mubr.bf16.mxu0 %v4751_v0 }
 0x21a   : > { %3650 = vmatmul.mubr.msk.bf16.gmra.mrb[32].mxu1 %vm624_vm2, %v1674_v4 }
 0x220   : > { %3763 = vmatmul.mubr.msk.bf16.gmra.mrb[32].mxu0 %vm624_vm2, %v2842_v5 }
 0x28d   : > { %v1564_v59 = vpop.f32.mrb[0].mxu1 }
 0x28e   : > { %v1566_v6 = vpop.f32.mrb[1].mxu1 }
 0x28f   : > { %v1568_v11 = vpop.f32.mrb[2].mxu1 }
 0x290   : > { %v1570_v12 = vpop.f32.mrb[3].mxu1 }
 0x295   : > { %v1574_v15 = vpop.f32.mrb[4].mxu1 }
 0x296   : > { %v1576_v16 = vpop.f32.mrb[5].mxu1 }
 0x297   : > { %v1578_v48 = vpop.f32.mrb[6].mxu1 }
 0x298   : > { %v1580_v56 = vpop.f32.mrb[7].mxu1 }
 0x29d   : > { %v1584_v26 = vpop.f32.mrb[8].mxu1 }
 0x29e   : > { %v5718_v38 = vpop.f32.mrb[9].mxu1 }
 0x29f   : > { %v5720_v0 = vpop.f32.mrb[10].mxu1 }
 0x2a0   : > { %v5722_v14 = vpop.f32.mrb[11].mxu1 }
 0x2a5   : > { %v5724_v17 = vpop.f32.mrb[12].mxu1 }
 0x2a6   : > { %v5726_v20 = vpop.f32.mrb[13].mxu1 }
 0x2a7   : > { %v5728_v24 = vpop.f32.mrb[14].mxu1 }
 0x2a8   : > { %v5730_v25 = vpop.f32.mrb[15].mxu1 }
 0x2ad   : > { %v5732_v28 = vpop.f32.mrb[16].mxu1 }
 0x2ae   : > { %v5734_v30 = vpop.f32.mrb[17].mxu1 }
 0x2af   : > { %v5736_v18 = vpop.f32.mrb[18].mxu1 }
 0x2b0   : > { %v5739_v36 = vpop.f32.mrb[19].mxu1 }
 0x2b3   : > { %v2944_v37 = vpop.f32.mrb[0].mxu0 }
 0x2b4   : > { %v3817_v44 = vadd.f32 %v2944_v37, %v1564_v59  ;;  %v2946_v45 = vpop.f32.mrb[1].mxu0 }
 0x2b5   : > { %v3818_v32 = vadd.f32 %v2946_v45, %v1566_v6  ;;  %v2948_v10 = vpop.f32.mrb[2].mxu0 }
 0x2b6   : > { %v3117_v46 = vadd.f32 %v3817_v44, %v5741_v39  ;;  %v3819_v23 = vadd.f32 %v2948_v10, %v1568_v11  ;;  %v2950_v52 = vpop.f32.mrb[3].mxu0 }
 0x2b7   : > { %v3118_v49 = vadd.f32 %v3818_v32, %v5744_v43  ;;  %v3820_v2 = vadd.f32 %v2950_v52, %v1570_v12 }
 0x2b8   : > { %v3153_v50 = vmax.f32 %v3117_v46, 0.0  ;;  %v3119_v53 = vadd.f32 %v3819_v23, %v5741_v39 }
 0x2b9   : > { %v3154_v54 = vmax.f32 %v3118_v49, 0.0  ;;  %v3120_v55 = vadd.f32 %v3820_v2, %v5744_v43 }
 0x2ba   : > { %v3155_v40 = vmax.f32 %v3119_v53, 0.0 }
 0x2bb   : > { %v3790_v58 = vpack.c.bf16 %v3154_v54, %v3153_v50  ;;  %v3156_v61 = vmax.f32 %v3120_v55, 0.0  ;;  %v2954_v9 = vpop.f32.mrb[4].mxu0 }
 0x2bc   : > { %v3821_v1 = vadd.f32 %v2954_v9, %v1574_v15  ;;  %v2956_v57 = vpop.f32.mrb[5].mxu0 }
 0x2bd   : > { %3297 = vst [vmem:[%s5752_s4] sm:$0xff] %v3790_v58  ;;  %v3791_v34 = vpack.c.bf16 %v3156_v61, %v3155_v40  ;;  %v3822_v31 = vadd.f32 %v2956_v57, %v1576_v16  ;;  %v2958_v41 = vpop.f32.mrb[6].mxu0 }
 0x2be   : > { %v3121_v8 = vadd.f32 %v3821_v1, %v5741_v39  ;;  %v3823_v51 = vadd.f32 %v2958_v41, %v1578_v48  ;;  %v2960_v62 = vpop.f32.mrb[7].mxu0 }
 0x2bf   : > { %3298 = vst [vmem:[%s5752_s4 + $0x8] sm:$0xff] %v3791_v34  ;;  %v3122_v42 = vadd.f32 %v3822_v31, %v5744_v43  ;;  %v3824_v47 = vadd.f32 %v2960_v62, %v1580_v56 }
 0x2c0   : > { %v3157_v19 = vmax.f32 %v3121_v8, 0.0  ;;  %v3123_v60 = vadd.f32 %v3823_v51, %v5741_v39 }
 0x2c1   : > { %v3158_v22 = vmax.f32 %v3122_v42, 0.0  ;;  %v3124_v63 = vadd.f32 %v3824_v47, %v5744_v43 }
 0x2c2   : > { %v3159_v35 = vmax.f32 %v3123_v60, 0.0 }
 0x2c3   : > { %v3792_v13 = vpack.c.bf16 %v3158_v22, %v3157_v19  ;;  %v3160_v4 = vmax.f32 %v3124_v63, 0.0  ;;  %v2964_v3 = vpop.f32.mrb[8].mxu0 }
 0x2c4   : > { %v3825_v5 = vadd.f32 %v2964_v3, %v1584_v26  ;;  %v2966_v59 = vpop.f32.mrb[9].mxu0 }
 0x2c5   : > { %3299 = vst [vmem:[%s5752_s4 + $0x10] sm:$0xff] %v3792_v13  ;;  %v3793_v6 = vpack.c.bf16 %v3160_v4, %v3159_v35  ;;  %v3826_v11 = vadd.f32 %v2966_v59, %v5718_v38  ;;  %v2968_v12 = vpop.f32.mrb[10].mxu0 }
 0x2c6   : > { %v3125_v15 = vadd.f32 %v3825_v5, %v5741_v39  ;;  %v3827_v16 = vadd.f32 %v2968_v12, %v5720_v0  ;;  %v2970_v48 = vpop.f32.mrb[11].mxu0 }
 0x2c7   : > { %3300 = vst [vmem:[%s5752_s4 + $0x18] sm:$0xff] %v3793_v6  ;;  %v3126_v56 = vadd.f32 %v3826_v11, %v5744_v43  ;;  %v3828_v21 = vadd.f32 %v2970_v48, %v5722_v14 }
 0x2c8   : > { %v3161_v27 = vmax.f32 %v3125_v15, 0.0  ;;  %v3127_v26 = vadd.f32 %v3827_v16, %v5741_v39 }
 0x2c9   : > { %v3162_v7 = vmax.f32 %v3126_v56, 0.0  ;;  %v3128_v29 = vadd.f32 %v3828_v21, %v5744_v43 }
 0x2ca   : > { %v3163_v38 = vmax.f32 %v3127_v26, 0.0 }
 0x2cb   : > { %v3794_v33 = vpack.c.bf16 %v3162_v7, %v3161_v27  ;;  %v3164_v37 = vmax.f32 %v3128_v29, 0.0  ;;  %v2974_v44 = vpop.f32.mrb[12].mxu0 }
 0x2cc   : > { %v3829_v45 = vadd.f32 %v2974_v44, %v5724_v17  ;;  %v2976_v0 = vpop.f32.mrb[13].mxu0 }
 0x2cd   : > { %3301 = vst [vmem:[%s5752_s4 + $0x20] sm:$0xff] %v3794_v33  ;;  %v3795_v32 = vpack.c.bf16 %v3164_v37, %v3163_v38  ;;  %v3830_v10 = vadd.f32 %v2976_v0, %v5726_v20  ;;  %v2978_v46 = vpop.f32.mrb[14].mxu0 }
 0x2ce   : > { %v3129_v14 = vadd.f32 %v3829_v45, %v5741_v39  ;;  %v3831_v23 = vadd.f32 %v2978_v46, %v5728_v24  ;;  %v2980_v52 = vpop.f32.mrb[15].mxu0 }
 0x2cf   : > { %3302 = vst [vmem:[%s5752_s4 + $0x28] sm:$0xff] %v3795_v32  ;;  %v3130_v49 = vadd.f32 %v3830_v10, %v5744_v43  ;;  %v3832_v2 = vadd.f32 %v2980_v52, %v5730_v25 }
 0x2d0   : > { %v3165_v50 = vmax.f32 %v3129_v14, 0.0  ;;  %v3131_v17 = vadd.f32 %v3831_v23, %v5741_v39 }
 0x2d1   : > { %v3166_v53 = vmax.f32 %v3130_v49, 0.0  ;;  %v3132_v54 = vadd.f32 %v3832_v2, %v5744_v43 }
 0x2d2   : > { %v3167_v20 = vmax.f32 %v3131_v17, 0.0 }
 0x2d3   : > { %v3796_v55 = vpack.c.bf16 %v3166_v53, %v3165_v50  ;;  %v3168_v40 = vmax.f32 %v3132_v54, 0.0  ;;  %v2984_v58 = vpop.f32.mrb[16].mxu0 }
 0x2d4   : > { %v3833_v61 = vadd.f32 %v2984_v58, %v5732_v28  ;;  %v2986_v24 = vpop.f32.mrb[17].mxu0 }
 0x2d5   : > { %3303 = vst [vmem:[%s5752_s4 + $0x30] sm:$0xff] %v3796_v55  ;;  %v3797_v9 = vpack.c.bf16 %v3168_v40, %v3167_v20  ;;  %v1826_v1 = vpop.f32.mrb[20].mxu1  ;;  %v3834_v57 = vadd.f32 %v2986_v24, %v5734_v30  ;;  %v2988_v25 = vpop.f32.mrb[18].mxu0 }
 0x2d6   : > { %v3133_v34 = vadd.f32 %v3833_v61, %v5741_v39  ;;  %v1828_v31 = vpop.f32.mrb[21].mxu1  ;;  %v3835_v41 = vadd.f32 %v2988_v25, %v5736_v18  ;;  %v2990_v8 = vpop.f32.mrb[19].mxu0 }
 0x2d7   : > { %3304 = vst [vmem:[%s5752_s4 + $0x38] sm:$0xff] %v3797_v9  ;;  %v3134_v51 = vadd.f32 %v3834_v57, %v5744_v43  ;;  %v1830_v62 = vpop.f32.mrb[22].mxu1  ;;  %v3836_v28 = vadd.f32 %v2990_v8, %v5739_v36 }
 0x2d8   : > { %v3169_v42 = vmax.f32 %v3133_v34, 0.0  ;;  %v3135_v47 = vadd.f32 %v3835_v41, %v5741_v39  ;;  %v1832_v19 = vpop.f32.mrb[23].mxu1 }
 0x2d9   : > { %v3170_v60 = vmax.f32 %v3134_v51, 0.0  ;;  %v3136_v30 = vadd.f32 %v3836_v28, %v5744_v43 }
 0x2da   : > { %v3171_v22 = vmax.f32 %v3135_v47, 0.0 }
 0x2db   : > { %v3798_v63 = vpack.c.bf16 %v3170_v60, %v3169_v42  ;;  %v3172_v35 = vmax.f32 %v3136_v30, 0.0  ;;  %v2994_v18 = vpop.f32.mrb[20].mxu0 }
 0x2dc   : > { %v3837_v13 = vadd.f32 %v2994_v18, %v1826_v1  ;;  %v2996_v4 = vpop.f32.mrb[21].mxu0 }
 0x2dd   : > { %3305 = vst [vmem:[%s5752_s4 + $0x40] sm:$0xff] %v3798_v63  ;;  %v3799_v3 = vpack.c.bf16 %v3172_v35, %v3171_v22  ;;  %v1836_v5 = vpop.f32.mrb[24].mxu1  ;;  %v3838_v59 = vadd.f32 %v2996_v4, %v1828_v31  ;;  %v2998_v6 = vpop.f32.mrb[22].mxu0 }
 0x2de   : > { %v3137_v36 = vadd.f32 %v3837_v13, %v5741_v39  ;;  %v1838_v11 = vpop.f32.mrb[25].mxu1  ;;  %v3839_v12 = vadd.f32 %v2998_v6, %v1830_v62  ;;  %v3000_v15 = vpop.f32.mrb[23].mxu0 }
 0x2df   : > { %3306 = vst [vmem:[%s5752_s4 + $0x48] sm:$0xff] %v3799_v3  ;;  %v3138_v16 = vadd.f32 %v3838_v59, %v5744_v43  ;;  %v1840_v48 = vpop.f32.mrb[26].mxu1  ;;  %v3840_v56 = vadd.f32 %v3000_v15, %v1832_v19 }
 0x2e0   : > { %v3173_v21 = vmax.f32 %v3137_v36, 0.0  ;;  %v3139_v27 = vadd.f32 %v3839_v12, %v5741_v39  ;;  %v1842_v26 = vpop.f32.mrb[27].mxu1 }
 0x2e1   : > { %v3174_v7 = vmax.f32 %v3138_v16, 0.0  ;;  %v3140_v29 = vadd.f32 %v3840_v56, %v5744_v43 }
 0x2e2   : > { %v3175_v38 = vmax.f32 %v3139_v27, 0.0 }
 0x2e3   : > { %v3800_v33 = vpack.c.bf16 %v3174_v7, %v3173_v21  ;;  %v3176_v37 = vmax.f32 %v3140_v29, 0.0  ;;  %v3004_v44 = vpop.f32.mrb[24].mxu0 }
 0x2e4   : > { %v3841_v45 = vadd.f32 %v3004_v44, %v1836_v5  ;;  %v3006_v0 = vpop.f32.mrb[25].mxu0 }
 0x2e5   : > { %3307 = vst [vmem:[%s5752_s4 + $0x50] sm:$0xff] %v3800_v33  ;;  %v3801_v32 = vpack.c.bf16 %v3176_v37, %v3175_v38  ;;  %v1846_v10 = vpop.f32.mrb[28].mxu1  ;;  %v3842_v46 = vadd.f32 %v3006_v0, %v1838_v11  ;;  %v3008_v14 = vpop.f32.mrb[26].mxu0 }
 0x2e6   : > { %v3141_v23 = vadd.f32 %v3841_v45, %v5741_v39  ;;  %v1848_v52 = vpop.f32.mrb[29].mxu1  ;;  %v3843_v49 = vadd.f32 %v3008_v14, %v1840_v48  ;;  %v3010_v2 = vpop.f32.mrb[27].mxu0 }
 0x2e7   : > { %3308 = vst [vmem:[%s5752_s4 + $0x58] sm:$0xff] %v3801_v32  ;;  %v3142_v50 = vadd.f32 %v3842_v46, %v5744_v43  ;;  %v1850_v17 = vpop.f32.mrb[30].mxu1  ;;  %v3844_v53 = vadd.f32 %v3010_v2, %v1842_v26 }
 0x2e8   : > { %v3177_v54 = vmax.f32 %v3141_v23, 0.0  ;;  %v3143_v20 = vadd.f32 %v3843_v49, %v5741_v39  ;;  %v1852_v55 = vpop.f32.mrb[31].mxu1 }
 0x2e9   : > { %v3178_v40 = vmax.f32 %v3142_v50, 0.0  ;;  %v3144_v58 = vadd.f32 %v3844_v53, %v5744_v43 }
 0x2ea   : > { %v3179_v61 = vmax.f32 %v3143_v20, 0.0 }
 0x2eb   : > { %v3802_v24 = vpack.c.bf16 %v3178_v40, %v3177_v54  ;;  %v3180_v9 = vmax.f32 %v3144_v58, 0.0  ;;  %v3014_v1 = vpop.f32.mrb[28].mxu0 }
 0x2ec   : > { %v3845_v57 = vadd.f32 %v3014_v1, %v1846_v10  ;;  %v3016_v25 = vpop.f32.mrb[29].mxu0 }
 0x2ed   : > { %3309 = vst [vmem:[%s5752_s4 + $0x60] sm:$0xff] %v3802_v24  ;;  %v3803_v34 = vpack.c.bf16 %v3180_v9, %v3179_v61  ;;  %v1856_v31 = vpop.f32.mrb[32].mxu1  ;;  %v3846_v41 = vadd.f32 %v3016_v25, %v1848_v52  ;;  %v3018_v8 = vpop.f32.mrb[30].mxu0 }
 0x2ee   : > { %v3145_v51 = vadd.f32 %v3845_v57, %v5741_v39  ;;  %v1858_v62 = vpop.f32.mrb[33].mxu1  ;;  %v3847_v28 = vadd.f32 %v3018_v8, %v1850_v17  ;;  %v3020_v42 = vpop.f32.mrb[31].mxu0 }
 0x2ef   : > { %3310 = vst [vmem:[%s5752_s4 + $0x68] sm:$0xff] %v3803_v34  ;;  %v3146_v47 = vadd.f32 %v3846_v41, %v5744_v43  ;;  %v1860_v19 = vpop.f32.mrb[34].mxu1  ;;  %v3848_v60 = vadd.f32 %v3020_v42, %v1852_v55 }
 0x2f0   : > { %v3181_v30 = vmax.f32 %v3145_v51, 0.0  ;;  %v3147_v22 = vadd.f32 %v3847_v28, %v5741_v39  ;;  %v1862_v63 = vpop.f32.mrb[35].mxu1 }
 0x2f1   : > { %v3182_v35 = vmax.f32 %v3146_v47, 0.0  ;;  %v3148_v18 = vadd.f32 %v3848_v60, %v5744_v43 }
 0x2f2   : > { %v3183_v13 = vmax.f32 %v3147_v22, 0.0 }
 0x2f3   : > { %v3804_v4 = vpack.c.bf16 %v3182_v35, %v3181_v30  ;;  %v3184_v3 = vmax.f32 %v3148_v18, 0.0  ;;  %v3024_v5 = vpop.f32.mrb[32].mxu0 }
 0x2f4   : > { %v3849_v59 = vadd.f32 %v3024_v5, %v1856_v31  ;;  %v3026_v6 = vpop.f32.mrb[33].mxu0 }
 0x2f5   : > { %3311 = vst [vmem:[%s5752_s4 + $0x70] sm:$0xff] %v3804_v4  ;;  %v3805_v36 = vpack.c.bf16 %v3184_v3, %v3183_v13  ;;  %v3850_v11 = vadd.f32 %v3026_v6, %v1858_v62  ;;  %v3028_v12 = vpop.f32.mrb[34].mxu0 }
 0x2f6   : > { %v3149_v15 = vadd.f32 %v3849_v59, %v5741_v39  ;;  %v3851_v16 = vadd.f32 %v3028_v12, %v1860_v19  ;;  %v3030_v48 = vpop.f32.mrb[35].mxu0 }
 0x2f7   : > { %3312 = vst [vmem:[%s5752_s4 + $0x78] sm:$0xff] %v3805_v36  ;;  %v3150_v56 = vadd.f32 %v3850_v11, %v5744_v43  ;;  %v3852_v21 = vadd.f32 %v3030_v48, %v1862_v63 }
 0x2f8   : > { %v3185_v27 = vmax.f32 %v3149_v15, 0.0  ;;  %v3151_v26 = vadd.f32 %v3851_v16, %v5741_v39 }
 0x2f9   : > { %v3186_v7 = vmax.f32 %v3150_v56, 0.0  ;;  %v3152_v29 = vadd.f32 %v3852_v21, %v5744_v43 }
 0x2fa   : > { %v3187_v38 = vmax.f32 %v3151_v26, 0.0 }
 0x2fb   : > { %v3806_v33 = vpack.c.bf16 %v3186_v7, %v3185_v27  ;;  %v3188_v37 = vmax.f32 %v3152_v29, 0.0 }
 0x2fd   : > { %3313 = vst [vmem:[%s5752_s4 + $0x80] sm:$0xff] %v3806_v33  ;;  %v3807_v39 = vpack.c.bf16 %v3188_v37, %v3187_v38 }
 0x2ff   : > { %3314 = vst [vmem:[%s5752_s4 + $0x88] sm:$0xff] %v3807_v39 }
 0x300   : > { %4571 = shalt.err (!%p4568_p6)
}
 0x301   : > { %s4572_s9 = scalar_lea.hbm %s5821_s21, 2304  ;;  %s4576_s4 = scalar_lea.hbm %s5989_s7, 13824 }
 0x302   : > { %p4573_p1 = scmp.ne.s32.totalorder %s5821_s21, %s4572_s9  ;;  %p4577_p10 = scmp.lt.u32.totalorder %s5821_s21, %s5989_s7 }
 0x303   : > { %p4578_p5 = scmp.lt.u32.totalorder %s4576_s4, %s4572_s9  ;;  %p4580_p7 = scmp.lt.u32.totalorder %s4572_s9, %s5821_s21 }
 0x304   : > { %p4574_p4 = pnand %p4573_p1, %p5990_p3 }
 0x305   : > { %p4579_p8 = por %p4578_p5, %p4577_p10 }
 0x306   : > { %p4575_p13 = pneg %p4574_p4 }
 0x307   : > { %p4581_p9 = por %p4580_p7, %p4579_p8 }
 0x309   : > { %p4582_p12 = pnand %p4581_p9, %p4575_p13 }
 0x30b   : > { %4585 = shalt.err (!%p4582_p12)
}
 0x30c   : > { %s4753_s1 = smov 128   ;;  %s4754_s12 = smov 256  }
 0x30d   : > { %s4755_s10 = smov 8  }
 0x30e   : > { %4120 = dma.vmem_to_hbm [thread:$0]  (%p5990_p3), %s5816_s15, 2304, %s5821_s21, %s5827_s29, %s4753_s1, %s4754_s12, %s4755_s10  }
 0x30f PF: > { %s5991_s18 = sld [smem:[#allocation18_spill]]  ;;  %s5992_s11 = sld [smem:[#allocation32_spill]] }
 0x310   : > { %p4140_p0 = scmp.ge.s32.totalorder %s4740_s5, 2 }
 0x315   : > { %s3349_s28 = sand.u32 1, %s5991_s18   ;;  %p5993_p11 = scmp.ne.s32.totalorder %s5992_s11, 0 }
 0x316   : > { %s3350_s14 = scalar_lea.sflag [#allocation6], %s3349_s28 }
 0x317   : > { %p4136_p2 = pnand %p4140_p0, %p5993_p11 }
 0x319   : > { %4671 = dma.done.wait (!%p4136_p2), %s3350_s14, 2304  }
 0x31a   : > { %4673 = vsyncadd (!%p4136_p2), %s3350_s14, 4294964992  ;;  %s26_s5 = sadd.s32 1, %s4740_s5   ;;  %s5995_s27 = sld [smem:[#allocation19_spill]] }
 0x31b   : > { %p5856_p6 = scmp.ge.s32.totalorder %s26_s5, 8   ;;  %s5996_s21 = sld [smem:[#allocation30_spill]] }
 0x31c   : > { %s5997_s18 = sld [smem:[#allocation20_spill]]  ;;  %s5998_s29 = sld [smem:[#allocation28_spill]] }
 0x31d   : > { %s5999_s6 = sld [smem:[#allocation21_spill]]  ;;  %s6000_s23 = sld [smem:[#allocation27_spill]] }
 0x31e   : > { %s6001_s9 = smov %s5016_s19  ;;  %s6002_s8 = sld [smem:[#allocation24_spill]] }
 0x31f   : > { %s6003_s13 = sld [smem:[#allocation25_spill]]  ;;  %s6004_s4 = sld [smem:[#allocation26_spill]] }
 0x320   : > { %s6005_s15 = smov %s4680_s16  ;;  %s6006_s16 = smov %s5995_s27 }
 0x321   : > { %s6008_s17 = smov %s5996_s21  ;;  %s6009_s19 = smov %s4696_s20 }
 0x322   : > { %s6010_s20 = smov %s5998_s29  ;;  %s6011_s21 = smov %s4704_s22 }
 0x323   : > { %s6012_s22 = smov %s5999_s6  ;;  %s6013_s24 = smov %s4716_s25 }
 0x324   : > { %s6014_s25 = smov %s4720_s26  ;;  %s6015_s26 = smov %s6001_s9 }
 0x325   : > { %s6016_s27 = smov %s6002_s8  ;;  %s6017_s28 = smov %s4736_s30 }
 0x326   : > { %s6018_s29 = smov %s6003_s13  ;;  %s6019_s30 = smov %s6004_s4 }
 0x327   :  { %25 = sbr.rel (!%p5856_p6) target bundleno = 20 (0x14), region = 126 }
 0x32e   :  { %3355 = vsyncpa [#allocation5], 1 }
 0x32f   :  { %3357 = vsyncpa [#allocation5 + $0x1], 1 }
 0x330   :  { %3358 = vsyncpa [#allocation8], 1 }
 0x331   :  { %3360 = vsyncpa [#allocation8 + $0x1], 1 }
 0x332   :  { %3361 = vsyncpa [#allocation11], 1 }
 0x333   :  { %3363 = vsyncpa [#allocation11 + $0x1], 1 }
 0x334   :  { %3364 = vsyncpa [#allocation6], 1 }
 0x335   :  { %3366 = vsyncpa [#allocation6 + $0x1], 1 }

</bundles_post_ra>
